<compile_context>
chip_gen: v6e
topology: v6e:2x2x1
jax: 0.10.0
libtpu: 0.0.40
codegen_flags: <defaults>
</compile_context>

<pallas_src>
import jax
import jax.numpy as jnp
import numpy as np
from jax.experimental import pallas as pl
from jax.experimental.pallas import tpu as pltpu


# ----------------------------------------------------------------------------
# Fused Pallas kernel: all LSTM layers + FC in one invocation
# ----------------------------------------------------------------------------
def _make_fused_lstm_fc_kernel(T, B, H, n_layers):
    """Build a kernel closure for static (T, B, H, n_layers).

    Kernel ref layout (all VMEM-resident, no grid):
      x_ref                      : (T*B, D)  time-major flattened input
      per layer l: wx, wh, b     : (D_l, 4H), (H, 4H), (1, 4H)
      wfc_ref, bfc_ref           : (H, O), (1, O)
      out_ref                    : (B, O)
    """

    def kernel(*refs):
        x_ref = refs[0]
        layer_refs = refs[1:1 + 3 * n_layers]
        wfc_ref = refs[1 + 3 * n_layers]
        bfc_ref = refs[2 + 3 * n_layers]
        out_ref = refs[3 + 3 * n_layers]

        layer_in = x_ref[...]  # (T*B, D_in), rows ordered t*B + b (time-major)

        h = None
        for l in range(n_layers):
            wx = layer_refs[3 * l][...]       # (D_l, 4H)
            wh = layer_refs[3 * l + 1][...]   # (H, 4H)
            b = layer_refs[3 * l + 2][...]    # (1, 4H)

            # Hoisted input projection for all timesteps at once (no recurrence
            # in this term): (T*B, 4H) = layer_in @ Wx + b.  Bias folded here so
            # there is no per-step broadcast inside the recurrence.
            xw = jnp.dot(layer_in, wx, preferred_element_type=jnp.float32) + b

            h = jnp.zeros((B, H), jnp.float32)
            c = jnp.zeros((B, H), jnp.float32)
            hs = []

            # Recurrence: fully unrolled at trace time (T small & static);
            # state stays in vregs; one MXU dot (h @ Wh) per step.
            for t in range(T):
                gates = xw[t * B:(t + 1) * B, :] + jnp.dot(
                    h, wh, preferred_element_type=jnp.float32
                )
                # torch gate order: i, f, g, o
                i_g = jax.nn.sigmoid(gates[:, 0 * H:1 * H])
                f_g = jax.nn.sigmoid(gates[:, 1 * H:2 * H])
                g_g = jnp.tanh(gates[:, 2 * H:3 * H])
                o_g = jax.nn.sigmoid(gates[:, 3 * H:4 * H])
                c = f_g * c + i_g * g_g
                h = o_g * jnp.tanh(c)
                if l < n_layers - 1:
                    hs.append(h)

            if l < n_layers - 1:
                # Hidden sequence for the next layer stays on-chip (vregs/VMEM),
                # never touching HBM.  Time-major (T*B, H).
                layer_in = jnp.concatenate(hs, axis=0)

        # Fused final Linear on the last timestep of the top layer.  Single
        # (B, O) store — no per-step masked stores anywhere in the kernel.
        out_ref[...] = (
            jnp.dot(h, wfc_ref[...], preferred_element_type=jnp.float32)
            + bfc_ref[...]
        )

    return kernel


# ----------------------------------------------------------------------------
# Wrapper
# ----------------------------------------------------------------------------
@jax.jit
def simple_lstm_forward(x_btd, params):
    """Full SimpleLSTM.forward: x (B, T, input_dim) -> (B, output_dim)."""
    B, T, D = x_btd.shape
    H = params["lstm"][0]["wh"].shape[0]
    O = params["fc_w"].shape[1]
    n_layers = len(params["lstm"])

    # Time-major, flattened so the in-kernel input projection is one big matmul:
    # row index = t*B + b.
    x_flat = (
        jnp.transpose(x_btd, (1, 0, 2)).reshape(T * B, D).astype(jnp.float32)
    )

    args = [x_flat]
    for lp in params["lstm"]:
        args += [lp["wx"], lp["wh"], lp["b"]]
    args += [params["fc_w"], params["fc_b"]]

    kernel = _make_fused_lstm_fc_kernel(T, B, H, n_layers)

    # No grid: everything (weights + activations) lives in VMEM for the single
    # invocation, so no double-buffering of resident weights is ever allocated.
    # TODO(synk): for large T, swap the trace-time unroll for a lax.fori_loop
    # writing the hidden sequence into a VMEM scratch; for large B on v7x, add a
    # 'parallel' batch grid axis so both TensorCores are used.
    vmem_spec = pl.BlockSpec(memory_space=pltpu.MemorySpace.VMEM)
    return pl.pallas_call(
        kernel,
        out_shape=jax.ShapeDtypeStruct((B, O), jnp.float32),
        in_specs=[vmem_spec] * len(args),
        out_specs=vmem_spec,
    )(*args)


# ----------------------------------------------------------------------------
# Deterministic parameter init (matches PyTorch shapes / gate order i,f,g,o)
# ----------------------------------------------------------------------------
def init_params(key, input_dim, hidden_dim, layer_dim, output_dim):
    bound = 1.0 / np.sqrt(hidden_dim)
    params = {"lstm": []}
    for layer in range(layer_dim):
        d_in = input_dim if layer == 0 else hidden_dim
        key, k1, k2, k3, k4 = jax.random.split(key, 5)
        w_ih = jax.random.uniform(k1, (4 * hidden_dim, d_in), jnp.float32,
                                  -bound, bound)
        w_hh = jax.random.uniform(k2, (4 * hidden_dim, hidden_dim), jnp.float32,
                                  -bound, bound)
        b_ih = jax.random.uniform(k3, (4 * hidden_dim,), jnp.float32,
                                  -bound, bound)
        b_hh = jax.random.uniform(k4, (4 * hidden_dim,), jnp.float32,
                                  -bound, bound)
        params["lstm"].append({
            "wx": w_ih.T,                            # (D, 4H)
            "wh": w_hh.T,                            # (H, 4H)
            "b": (b_ih + b_hh).reshape(1, -1),       # (1, 4H)
        })
    key, k5, k6 = jax.random.split(key, 3)
    fc_bound = 1.0 / np.sqrt(hidden_dim)
    fc_w = jax.random.uniform(k5, (output_dim, hidden_dim), jnp.float32,
                              -fc_bound, fc_bound)
    fc_b = jax.random.uniform(k6, (output_dim,), jnp.float32,
                              -fc_bound, fc_bound)
    params["fc_w"] = fc_w.T                 # (H, O)
    params["fc_b"] = fc_b.reshape(1, -1)    # (1, O)
    return params


# ----------------------------------------------------------------------------
# Pure-JAX reference (mirrors torch.nn.LSTM + Linear) for correctness checking
# ----------------------------------------------------------------------------
def reference_forward(x_btd, params, hidden_dim):
    B = x_btd.shape[0]
    layer_in = x_btd.astype(jnp.float32)
    for lp in params["lstm"]:
        h = jnp.zeros((B, hidden_dim), jnp.float32)
        c = jnp.zeros((B, hidden_dim), jnp.float32)
        outs = []
        for t in range(layer_in.shape[1]):
            gates = layer_in[:, t, :] @ lp["wx"] + h @ lp["wh"] + lp["b"]
            i = jax.nn.sigmoid(gates[:, 0 * hidden_dim:1 * hidden_dim])
            f = jax.nn.sigmoid(gates[:, 1 * hidden_dim:2 * hidden_dim])
            g = jnp.tanh(gates[:, 2 * hidden_dim:3 * hidden_dim])
            o = jax.nn.sigmoid(gates[:, 3 * hidden_dim:4 * hidden_dim])
            c = f * c + i * g
            h = o * jnp.tanh(c)
            outs.append(h)
        layer_in = jnp.stack(outs, axis=1)
    return layer_in[:, -1, :] @ params["fc_w"] + params["fc_b"]


# ----------------------------------------------------------------------------
if __name__ == "__main__":
    # Small shapes implied by the module's forward: x is (batch, seq, input_dim)
    batch, seq, input_dim = 2, 8, 16
    hidden_dim, layer_dim, output_dim = 32, 2, 4

    key = jax.random.PRNGKey(0)
    key, kx, kp = jax.random.split(key, 3)
    x = jax.random.normal(kx, (batch, seq, input_dim), jnp.float32)
    params = init_params(kp, input_dim, hidden_dim, layer_dim, output_dim)

    out = simple_lstm_forward(x, params)
    out = jax.block_until_ready(out)

    ref = reference_forward(x, params, hidden_dim)
    np.testing.assert_allclose(np.asarray(out), np.asarray(ref),
                               rtol=1e-5, atol=2e-5)
    assert out.shape == (batch, output_dim)
    print("KERNEL_OK")
</pallas_src>

<mosaic_0001>
module attributes {stable_mosaic.version = 11 : i64} {
  func.func @kernel(%arg0: memref<16x16xf32, #tpu.memory_space<vmem>>, %arg1: memref<16x128xf32, #tpu.memory_space<vmem>>, %arg2: memref<32x128xf32, #tpu.memory_space<vmem>>, %arg3: memref<1x128xf32, #tpu.memory_space<vmem>>, %arg4: memref<32x128xf32, #tpu.memory_space<vmem>>, %arg5: memref<32x128xf32, #tpu.memory_space<vmem>>, %arg6: memref<1x128xf32, #tpu.memory_space<vmem>>, %arg7: memref<32x4xf32, #tpu.memory_space<vmem>>, %arg8: memref<1x4xf32, #tpu.memory_space<vmem>>, %arg9: memref<2x4xf32, #tpu.memory_space<vmem>>) attributes {dimension_semantics = [], scalar_prefetch = 0 : i64, scratch_operands = 0 : i64, tpu.core_type = #tpu.core_type<tc>} {
    %c0 = arith.constant 0 : index
    %c0_0 = arith.constant 0 : index
    %0 = vector.load %arg0[%c0, %c0_0] : memref<16x16xf32, #tpu.memory_space<vmem>>, vector<16x16xf32>
    %c0_1 = arith.constant 0 : index
    %c0_2 = arith.constant 0 : index
    %1 = vector.load %arg1[%c0_1, %c0_2] : memref<16x128xf32, #tpu.memory_space<vmem>>, vector<16x128xf32>
    %c0_3 = arith.constant 0 : index
    %c0_4 = arith.constant 0 : index
    %2 = vector.load %arg2[%c0_3, %c0_4] : memref<32x128xf32, #tpu.memory_space<vmem>>, vector<32x128xf32>
    %c0_5 = arith.constant 0 : index
    %c0_6 = arith.constant 0 : index
    %3 = vector.load %arg3[%c0_5, %c0_6] : memref<1x128xf32, #tpu.memory_space<vmem>>, vector<1x128xf32>
    %cst = arith.constant dense<0.000000e+00> : vector<16x128xf32>
    %4 = tpu.matmul %0, %1, %cst {dimension_numbers = #tpu.dot_dimension_numbers<[1], [0], [0], [1], [0, 0, 1, 1], [], []>} : vector<16x16xf32>, vector<16x128xf32>, vector<16x128xf32> -> vector<16x128xf32>
    %5 = vector.broadcast %3 : vector<1x128xf32> to vector<16x128xf32>
    %6 = arith.addf %4, %5 : vector<16x128xf32>
    %cst_7 = arith.constant 0.000000e+00 : f32
    %7 = vector.broadcast %cst_7 : f32 to vector<2x32xf32>
    %cst_8 = arith.constant 0.000000e+00 : f32
    %8 = vector.broadcast %cst_8 : f32 to vector<2x32xf32>
    %9 = vector.extract_strided_slice %6 {offsets = [0, 0], sizes = [2, 128], strides = [1, 1]} : vector<16x128xf32> to vector<2x128xf32>
    %cst_9 = arith.constant dense<0.000000e+00> : vector<2x128xf32>
    %10 = tpu.matmul %7, %2, %cst_9 {dimension_numbers = #tpu.dot_dimension_numbers<[1], [0], [0], [1], [0, 0, 1, 1], [], []>} : vector<2x32xf32>, vector<32x128xf32>, vector<2x128xf32> -> vector<2x128xf32>
    %11 = arith.addf %9, %10 : vector<2x128xf32>
    %12 = vector.extract_strided_slice %11 {offsets = [0, 0], sizes = [2, 32], strides = [1, 1]} : vector<2x128xf32> to vector<2x32xf32>
    %13 = arith.negf %12 : vector<2x32xf32>
    %14 = math.exp %13 : vector<2x32xf32>
    %cst_10 = arith.constant 1.000000e+00 : f32
    %15 = vector.broadcast %cst_10 : f32 to vector<2x32xf32>
    %16 = arith.addf %15, %14 : vector<2x32xf32>
    %17 = arith.divf %15, %16 : vector<2x32xf32>
    %18 = vector.extract_strided_slice %11 {offsets = [0, 32], sizes = [2, 32], strides = [1, 1]} : vector<2x128xf32> to vector<2x32xf32>
    %19 = arith.negf %18 : vector<2x32xf32>
    %20 = math.exp %19 : vector<2x32xf32>
    %cst_11 = arith.constant 1.000000e+00 : f32
    %21 = vector.broadcast %cst_11 : f32 to vector<2x32xf32>
    %22 = arith.addf %21, %20 : vector<2x32xf32>
    %23 = arith.divf %21, %22 : vector<2x32xf32>
    %24 = vector.extract_strided_slice %11 {offsets = [0, 64], sizes = [2, 32], strides = [1, 1]} : vector<2x128xf32> to vector<2x32xf32>
    %25 = math.tanh %24 : vector<2x32xf32>
    %26 = vector.extract_strided_slice %11 {offsets = [0, 96], sizes = [2, 32], strides = [1, 1]} : vector<2x128xf32> to vector<2x32xf32>
    %27 = arith.negf %26 : vector<2x32xf32>
    %28 = math.exp %27 : vector<2x32xf32>
    %cst_12 = arith.constant 1.000000e+00 : f32
    %29 = vector.broadcast %cst_12 : f32 to vector<2x32xf32>
    %30 = arith.addf %29, %28 : vector<2x32xf32>
    %31 = arith.divf %29, %30 : vector<2x32xf32>
    %32 = arith.mulf %23, %8 : vector<2x32xf32>
    %33 = arith.mulf %17, %25 : vector<2x32xf32>
    %34 = arith.addf %32, %33 : vector<2x32xf32>
    %35 = math.tanh %34 : vector<2x32xf32>
    %36 = arith.mulf %31, %35 : vector<2x32xf32>
    %37 = vector.extract_strided_slice %6 {offsets = [2, 0], sizes = [2, 128], strides = [1, 1]} : vector<16x128xf32> to vector<2x128xf32>
    %cst_13 = arith.constant dense<0.000000e+00> : vector<2x128xf32>
    %38 = tpu.matmul %36, %2, %cst_13 {dimension_numbers = #tpu.dot_dimension_numbers<[1], [0], [0], [1], [0, 0, 1, 1], [], []>} : vector<2x32xf32>, vector<32x128xf32>, vector<2x128xf32> -> vector<2x128xf32>
    %39 = arith.addf %37, %38 : vector<2x128xf32>
    %40 = vector.extract_strided_slice %39 {offsets = [0, 0], sizes = [2, 32], strides = [1, 1]} : vector<2x128xf32> to vector<2x32xf32>
    %41 = arith.negf %40 : vector<2x32xf32>
    %42 = math.exp %41 : vector<2x32xf32>
    %cst_14 = arith.constant 1.000000e+00 : f32
    %43 = vector.broadcast %cst_14 : f32 to vector<2x32xf32>
    %44 = arith.addf %43, %42 : vector<2x32xf32>
    %45 = arith.divf %43, %44 : vector<2x32xf32>
    %46 = vector.extract_strided_slice %39 {offsets = [0, 32], sizes = [2, 32], strides = [1, 1]} : vector<2x128xf32> to vector<2x32xf32>
    %47 = arith.negf %46 : vector<2x32xf32>
    %48 = math.exp %47 : vector<2x32xf32>
    %cst_15 = arith.constant 1.000000e+00 : f32
    %49 = vector.broadcast %cst_15 : f32 to vector<2x32xf32>
    %50 = arith.addf %49, %48 : vector<2x32xf32>
    %51 = arith.divf %49, %50 : vector<2x32xf32>
    %52 = vector.extract_strided_slice %39 {offsets = [0, 64], sizes = [2, 32], strides = [1, 1]} : vector<2x128xf32> to vector<2x32xf32>
    %53 = math.tanh %52 : vector<2x32xf32>
    %54 = vector.extract_strided_slice %39 {offsets = [0, 96], sizes = [2, 32], strides = [1, 1]} : vector<2x128xf32> to vector<2x32xf32>
    %55 = arith.negf %54 : vector<2x32xf32>
    %56 = math.exp %55 : vector<2x32xf32>
    %cst_16 = arith.constant 1.000000e+00 : f32
    %57 = vector.broadcast %cst_16 : f32 to vector<2x32xf32>
    %58 = arith.addf %57, %56 : vector<2x32xf32>
    %59 = arith.divf %57, %58 : vector<2x32xf32>
    %60 = arith.mulf %51, %34 : vector<2x32xf32>
    %61 = arith.mulf %45, %53 : vector<2x32xf32>
    %62 = arith.addf %60, %61 : vector<2x32xf32>
    %63 = math.tanh %62 : vector<2x32xf32>
    %64 = arith.mulf %59, %63 : vector<2x32xf32>
    %65 = vector.extract_strided_slice %6 {offsets = [4, 0], sizes = [2, 128], strides = [1, 1]} : vector<16x128xf32> to vector<2x128xf32>
    %cst_17 = arith.constant dense<0.000000e+00> : vector<2x128xf32>
    %66 = tpu.matmul %64, %2, %cst_17 {dimension_numbers = #tpu.dot_dimension_numbers<[1], [0], [0], [1], [0, 0, 1, 1], [], []>} : vector<2x32xf32>, vector<32x128xf32>, vector<2x128xf32> -> vector<2x128xf32>
    %67 = arith.addf %65, %66 : vector<2x128xf32>
    %68 = vector.extract_strided_slice %67 {offsets = [0, 0], sizes = [2, 32], strides = [1, 1]} : vector<2x128xf32> to vector<2x32xf32>
    %69 = arith.negf %68 : vector<2x32xf32>
    %70 = math.exp %69 : vector<2x32xf32>
    %cst_18 = arith.constant 1.000000e+00 : f32
    %71 = vector.broadcast %cst_18 : f32 to vector<2x32xf32>
    %72 = arith.addf %71, %70 : vector<2x32xf32>
    %73 = arith.divf %71, %72 : vector<2x32xf32>
    %74 = vector.extract_strided_slice %67 {offsets = [0, 32], sizes = [2, 32], strides = [1, 1]} : vector<2x128xf32> to vector<2x32xf32>
    %75 = arith.negf %74 : vector<2x32xf32>
    %76 = math.exp %75 : vector<2x32xf32>
    %cst_19 = arith.constant 1.000000e+00 : f32
    %77 = vector.broadcast %cst_19 : f32 to vector<2x32xf32>
    %78 = arith.addf %77, %76 : vector<2x32xf32>
    %79 = arith.divf %77, %78 : vector<2x32xf32>
    %80 = vector.extract_strided_slice %67 {offsets = [0, 64], sizes = [2, 32], strides = [1, 1]} : vector<2x128xf32> to vector<2x32xf32>
    %81 = math.tanh %80 : vector<2x32xf32>
    %82 = vector.extract_strided_slice %67 {offsets = [0, 96], sizes = [2, 32], strides = [1, 1]} : vector<2x128xf32> to vector<2x32xf32>
    %83 = arith.negf %82 : vector<2x32xf32>
    %84 = math.exp %83 : vector<2x32xf32>
    %cst_20 = arith.constant 1.000000e+00 : f32
    %85 = vector.broadcast %cst_20 : f32 to vector<2x32xf32>
    %86 = arith.addf %85, %84 : vector<2x32xf32>
    %87 = arith.divf %85, %86 : vector<2x32xf32>
    %88 = arith.mulf %79, %62 : vector<2x32xf32>
    %89 = arith.mulf %73, %81 : vector<2x32xf32>
    %90 = arith.addf %88, %89 : vector<2x32xf32>
    %91 = math.tanh %90 : vector<2x32xf32>
    %92 = arith.mulf %87, %91 : vector<2x32xf32>
    %93 = vector.extract_strided_slice %6 {offsets = [6, 0], sizes = [2, 128], strides = [1, 1]} : vector<16x128xf32> to vector<2x128xf32>
    %cst_21 = arith.constant dense<0.000000e+00> : vector<2x128xf32>
    %94 = tpu.matmul %92, %2, %cst_21 {dimension_numbers = #tpu.dot_dimension_numbers<[1], [0], [0], [1], [0, 0, 1, 1], [], []>} : vector<2x32xf32>, vector<32x128xf32>, vector<2x128xf32> -> vector<2x128xf32>
    %95 = arith.addf %93, %94 : vector<2x128xf32>
    %96 = vector.extract_strided_slice %95 {offsets = [0, 0], sizes = [2, 32], strides = [1, 1]} : vector<2x128xf32> to vector<2x32xf32>
    %97 = arith.negf %96 : vector<2x32xf32>
    %98 = math.exp %97 : vector<2x32xf32>
    %cst_22 = arith.constant 1.000000e+00 : f32
    %99 = vector.broadcast %cst_22 : f32 to vector<2x32xf32>
    %100 = arith.addf %99, %98 : vector<2x32xf32>
    %101 = arith.divf %99, %100 : vector<2x32xf32>
    %102 = vector.extract_strided_slice %95 {offsets = [0, 32], sizes = [2, 32], strides = [1, 1]} : vector<2x128xf32> to vector<2x32xf32>
    %103 = arith.negf %102 : vector<2x32xf32>
    %104 = math.exp %103 : vector<2x32xf32>
    %cst_23 = arith.constant 1.000000e+00 : f32
    %105 = vector.broadcast %cst_23 : f32 to vector<2x32xf32>
    %106 = arith.addf %105, %104 : vector<2x32xf32>
    %107 = arith.divf %105, %106 : vector<2x32xf32>
    %108 = vector.extract_strided_slice %95 {offsets = [0, 64], sizes = [2, 32], strides = [1, 1]} : vector<2x128xf32> to vector<2x32xf32>
    %109 = math.tanh %108 : vector<2x32xf32>
    %110 = vector.extract_strided_slice %95 {offsets = [0, 96], sizes = [2, 32], strides = [1, 1]} : vector<2x128xf32> to vector<2x32xf32>
    %111 = arith.negf %110 : vector<2x32xf32>
    %112 = math.exp %111 : vector<2x32xf32>
    %cst_24 = arith.constant 1.000000e+00 : f32
    %113 = vector.broadcast %cst_24 : f32 to vector<2x32xf32>
    %114 = arith.addf %113, %112 : vector<2x32xf32>
    %115 = arith.divf %113, %114 : vector<2x32xf32>
    %116 = arith.mulf %107, %90 : vector<2x32xf32>
    %117 = arith.mulf %101, %109 : vector<2x32xf32>
    %118 = arith.addf %116, %117 : vector<2x32xf32>
    %119 = math.tanh %118 : vector<2x32xf32>
    %120 = arith.mulf %115, %119 : vector<2x32xf32>
    %121 = vector.extract_strided_slice %6 {offsets = [8, 0], sizes = [2, 128], strides = [1, 1]} : vector<16x128xf32> to vector<2x128xf32>
    %cst_25 = arith.constant dense<0.000000e+00> : vector<2x128xf32>
    %122 = tpu.matmul %120, %2, %cst_25 {dimension_numbers = #tpu.dot_dimension_numbers<[1], [0], [0], [1], [0, 0, 1, 1], [], []>} : vector<2x32xf32>, vector<32x128xf32>, vector<2x128xf32> -> vector<2x128xf32>
    %123 = arith.addf %121, %122 : vector<2x128xf32>
    %124 = vector.extract_strided_slice %123 {offsets = [0, 0], sizes = [2, 32], strides = [1, 1]} : vector<2x128xf32> to vector<2x32xf32>
    %125 = arith.negf %124 : vector<2x32xf32>
    %126 = math.exp %125 : vector<2x32xf32>
    %cst_26 = arith.constant 1.000000e+00 : f32
    %127 = vector.broadcast %cst_26 : f32 to vector<2x32xf32>
    %128 = arith.addf %127, %126 : vector<2x32xf32>
    %129 = arith.divf %127, %128 : vector<2x32xf32>
    %130 = vector.extract_strided_slice %123 {offsets = [0, 32], sizes = [2, 32], strides = [1, 1]} : vector<2x128xf32> to vector<2x32xf32>
    %131 = arith.negf %130 : vector<2x32xf32>
    %132 = math.exp %131 : vector<2x32xf32>
    %cst_27 = arith.constant 1.000000e+00 : f32
    %133 = vector.broadcast %cst_27 : f32 to vector<2x32xf32>
    %134 = arith.addf %133, %132 : vector<2x32xf32>
    %135 = arith.divf %133, %134 : vector<2x32xf32>
    %136 = vector.extract_strided_slice %123 {offsets = [0, 64], sizes = [2, 32], strides = [1, 1]} : vector<2x128xf32> to vector<2x32xf32>
    %137 = math.tanh %136 : vector<2x32xf32>
    %138 = vector.extract_strided_slice %123 {offsets = [0, 96], sizes = [2, 32], strides = [1, 1]} : vector<2x128xf32> to vector<2x32xf32>
    %139 = arith.negf %138 : vector<2x32xf32>
    %140 = math.exp %139 : vector<2x32xf32>
    %cst_28 = arith.constant 1.000000e+00 : f32
    %141 = vector.broadcast %cst_28 : f32 to vector<2x32xf32>
    %142 = arith.addf %141, %140 : vector<2x32xf32>
    %143 = arith.divf %141, %142 : vector<2x32xf32>
    %144 = arith.mulf %135, %118 : vector<2x32xf32>
    %145 = arith.mulf %129, %137 : vector<2x32xf32>
    %146 = arith.addf %144, %145 : vector<2x32xf32>
    %147 = math.tanh %146 : vector<2x32xf32>
    %148 = arith.mulf %143, %147 : vector<2x32xf32>
    %149 = vector.extract_strided_slice %6 {offsets = [10, 0], sizes = [2, 128], strides = [1, 1]} : vector<16x128xf32> to vector<2x128xf32>
    %cst_29 = arith.constant dense<0.000000e+00> : vector<2x128xf32>
    %150 = tpu.matmul %148, %2, %cst_29 {dimension_numbers = #tpu.dot_dimension_numbers<[1], [0], [0], [1], [0, 0, 1, 1], [], []>} : vector<2x32xf32>, vector<32x128xf32>, vector<2x128xf32> -> vector<2x128xf32>
    %151 = arith.addf %149, %150 : vector<2x128xf32>
    %152 = vector.extract_strided_slice %151 {offsets = [0, 0], sizes = [2, 32], strides = [1, 1]} : vector<2x128xf32> to vector<2x32xf32>
    %153 = arith.negf %152 : vector<2x32xf32>
    %154 = math.exp %153 : vector<2x32xf32>
    %cst_30 = arith.constant 1.000000e+00 : f32
    %155 = vector.broadcast %cst_30 : f32 to vector<2x32xf32>
    %156 = arith.addf %155, %154 : vector<2x32xf32>
    %157 = arith.divf %155, %156 : vector<2x32xf32>
    %158 = vector.extract_strided_slice %151 {offsets = [0, 32], sizes = [2, 32], strides = [1, 1]} : vector<2x128xf32> to vector<2x32xf32>
    %159 = arith.negf %158 : vector<2x32xf32>
    %160 = math.exp %159 : vector<2x32xf32>
    %cst_31 = arith.constant 1.000000e+00 : f32
    %161 = vector.broadcast %cst_31 : f32 to vector<2x32xf32>
    %162 = arith.addf %161, %160 : vector<2x32xf32>
    %163 = arith.divf %161, %162 : vector<2x32xf32>
    %164 = vector.extract_strided_slice %151 {offsets = [0, 64], sizes = [2, 32], strides = [1, 1]} : vector<2x128xf32> to vector<2x32xf32>
    %165 = math.tanh %164 : vector<2x32xf32>
    %166 = vector.extract_strided_slice %151 {offsets = [0, 96], sizes = [2, 32], strides = [1, 1]} : vector<2x128xf32> to vector<2x32xf32>
    %167 = arith.negf %166 : vector<2x32xf32>
    %168 = math.exp %167 : vector<2x32xf32>
    %cst_32 = arith.constant 1.000000e+00 : f32
    %169 = vector.broadcast %cst_32 : f32 to vector<2x32xf32>
    %170 = arith.addf %169, %168 : vector<2x32xf32>
    %171 = arith.divf %169, %170 : vector<2x32xf32>
    %172 = arith.mulf %163, %146 : vector<2x32xf32>
    %173 = arith.mulf %157, %165 : vector<2x32xf32>
    %174 = arith.addf %172, %173 : vector<2x32xf32>
    %175 = math.tanh %174 : vector<2x32xf32>
    %176 = arith.mulf %171, %175 : vector<2x32xf32>
    %177 = vector.extract_strided_slice %6 {offsets = [12, 0], sizes = [2, 128], strides = [1, 1]} : vector<16x128xf32> to vector<2x128xf32>
    %cst_33 = arith.constant dense<0.000000e+00> : vector<2x128xf32>
    %178 = tpu.matmul %176, %2, %cst_33 {dimension_numbers = #tpu.dot_dimension_numbers<[1], [0], [0], [1], [0, 0, 1, 1], [], []>} : vector<2x32xf32>, vector<32x128xf32>, vector<2x128xf32> -> vector<2x128xf32>
    %179 = arith.addf %177, %178 : vector<2x128xf32>
    %180 = vector.extract_strided_slice %179 {offsets = [0, 0], sizes = [2, 32], strides = [1, 1]} : vector<2x128xf32> to vector<2x32xf32>
    %181 = arith.negf %180 : vector<2x32xf32>
    %182 = math.exp %181 : vector<2x32xf32>
    %cst_34 = arith.constant 1.000000e+00 : f32
    %183 = vector.broadcast %cst_34 : f32 to vector<2x32xf32>
    %184 = arith.addf %183, %182 : vector<2x32xf32>
    %185 = arith.divf %183, %184 : vector<2x32xf32>
    %186 = vector.extract_strided_slice %179 {offsets = [0, 32], sizes = [2, 32], strides = [1, 1]} : vector<2x128xf32> to vector<2x32xf32>
    %187 = arith.negf %186 : vector<2x32xf32>
    %188 = math.exp %187 : vector<2x32xf32>
    %cst_35 = arith.constant 1.000000e+00 : f32
    %189 = vector.broadcast %cst_35 : f32 to vector<2x32xf32>
    %190 = arith.addf %189, %188 : vector<2x32xf32>
    %191 = arith.divf %189, %190 : vector<2x32xf32>
    %192 = vector.extract_strided_slice %179 {offsets = [0, 64], sizes = [2, 32], strides = [1, 1]} : vector<2x128xf32> to vector<2x32xf32>
    %193 = math.tanh %192 : vector<2x32xf32>
    %194 = vector.extract_strided_slice %179 {offsets = [0, 96], sizes = [2, 32], strides = [1, 1]} : vector<2x128xf32> to vector<2x32xf32>
    %195 = arith.negf %194 : vector<2x32xf32>
    %196 = math.exp %195 : vector<2x32xf32>
    %cst_36 = arith.constant 1.000000e+00 : f32
    %197 = vector.broadcast %cst_36 : f32 to vector<2x32xf32>
    %198 = arith.addf %197, %196 : vector<2x32xf32>
    %199 = arith.divf %197, %198 : vector<2x32xf32>
    %200 = arith.mulf %191, %174 : vector<2x32xf32>
    %201 = arith.mulf %185, %193 : vector<2x32xf32>
    %202 = arith.addf %200, %201 : vector<2x32xf32>
    %203 = math.tanh %202 : vector<2x32xf32>
    %204 = arith.mulf %199, %203 : vector<2x32xf32>
    %205 = vector.extract_strided_slice %6 {offsets = [14, 0], sizes = [2, 128], strides = [1, 1]} : vector<16x128xf32> to vector<2x128xf32>
    %cst_37 = arith.constant dense<0.000000e+00> : vector<2x128xf32>
    %206 = tpu.matmul %204, %2, %cst_37 {dimension_numbers = #tpu.dot_dimension_numbers<[1], [0], [0], [1], [0, 0, 1, 1], [], []>} : vector<2x32xf32>, vector<32x128xf32>, vector<2x128xf32> -> vector<2x128xf32>
    %207 = arith.addf %205, %206 : vector<2x128xf32>
    %208 = vector.extract_strided_slice %207 {offsets = [0, 0], sizes = [2, 32], strides = [1, 1]} : vector<2x128xf32> to vector<2x32xf32>
    %209 = arith.negf %208 : vector<2x32xf32>
    %210 = math.exp %209 : vector<2x32xf32>
    %cst_38 = arith.constant 1.000000e+00 : f32
    %211 = vector.broadcast %cst_38 : f32 to vector<2x32xf32>
    %212 = arith.addf %211, %210 : vector<2x32xf32>
    %213 = arith.divf %211, %212 : vector<2x32xf32>
    %214 = vector.extract_strided_slice %207 {offsets = [0, 32], sizes = [2, 32], strides = [1, 1]} : vector<2x128xf32> to vector<2x32xf32>
    %215 = arith.negf %214 : vector<2x32xf32>
    %216 = math.exp %215 : vector<2x32xf32>
    %cst_39 = arith.constant 1.000000e+00 : f32
    %217 = vector.broadcast %cst_39 : f32 to vector<2x32xf32>
    %218 = arith.addf %217, %216 : vector<2x32xf32>
    %219 = arith.divf %217, %218 : vector<2x32xf32>
    %220 = vector.extract_strided_slice %207 {offsets = [0, 64], sizes = [2, 32], strides = [1, 1]} : vector<2x128xf32> to vector<2x32xf32>
    %221 = math.tanh %220 : vector<2x32xf32>
    %222 = vector.extract_strided_slice %207 {offsets = [0, 96], sizes = [2, 32], strides = [1, 1]} : vector<2x128xf32> to vector<2x32xf32>
    %223 = arith.negf %222 : vector<2x32xf32>
    %224 = math.exp %223 : vector<2x32xf32>
    %cst_40 = arith.constant 1.000000e+00 : f32
    %225 = vector.broadcast %cst_40 : f32 to vector<2x32xf32>
    %226 = arith.addf %225, %224 : vector<2x32xf32>
    %227 = arith.divf %225, %226 : vector<2x32xf32>
    %228 = arith.mulf %219, %202 : vector<2x32xf32>
    %229 = arith.mulf %213, %221 : vector<2x32xf32>
    %230 = arith.addf %228, %229 : vector<2x32xf32>
    %231 = math.tanh %230 : vector<2x32xf32>
    %232 = arith.mulf %227, %231 : vector<2x32xf32>
    %233 = tpu.concatenate %36, %64, %92, %120, %148, %176, %204, %232 in 0 : vector<2x32xf32>, vector<2x32xf32>, vector<2x32xf32>, vector<2x32xf32>, vector<2x32xf32>, vector<2x32xf32>, vector<2x32xf32>, vector<2x32xf32> -> vector<16x32xf32>
    %c0_41 = arith.constant 0 : index
    %c0_42 = arith.constant 0 : index
    %234 = vector.load %arg4[%c0_41, %c0_42] : memref<32x128xf32, #tpu.memory_space<vmem>>, vector<32x128xf32>
    %c0_43 = arith.constant 0 : index
    %c0_44 = arith.constant 0 : index
    %235 = vector.load %arg5[%c0_43, %c0_44] : memref<32x128xf32, #tpu.memory_space<vmem>>, vector<32x128xf32>
    %c0_45 = arith.constant 0 : index
    %c0_46 = arith.constant 0 : index
    %236 = vector.load %arg6[%c0_45, %c0_46] : memref<1x128xf32, #tpu.memory_space<vmem>>, vector<1x128xf32>
    %cst_47 = arith.constant dense<0.000000e+00> : vector<16x128xf32>
    %237 = tpu.matmul %233, %234, %cst_47 {dimension_numbers = #tpu.dot_dimension_numbers<[1], [0], [0], [1], [0, 0, 1, 1], [], []>} : vector<16x32xf32>, vector<32x128xf32>, vector<16x128xf32> -> vector<16x128xf32>
    %238 = vector.broadcast %236 : vector<1x128xf32> to vector<16x128xf32>
    %239 = arith.addf %237, %238 : vector<16x128xf32>
    %cst_48 = arith.constant 0.000000e+00 : f32
    %240 = vector.broadcast %cst_48 : f32 to vector<2x32xf32>
    %cst_49 = arith.constant 0.000000e+00 : f32
    %241 = vector.broadcast %cst_49 : f32 to vector<2x32xf32>
    %242 = vector.extract_strided_slice %239 {offsets = [0, 0], sizes = [2, 128], strides = [1, 1]} : vector<16x128xf32> to vector<2x128xf32>
    %cst_50 = arith.constant dense<0.000000e+00> : vector<2x128xf32>
    %243 = tpu.matmul %240, %235, %cst_50 {dimension_numbers = #tpu.dot_dimension_numbers<[1], [0], [0], [1], [0, 0, 1, 1], [], []>} : vector<2x32xf32>, vector<32x128xf32>, vector<2x128xf32> -> vector<2x128xf32>
    %244 = arith.addf %242, %243 : vector<2x128xf32>
    %245 = vector.extract_strided_slice %244 {offsets = [0, 0], sizes = [2, 32], strides = [1, 1]} : vector<2x128xf32> to vector<2x32xf32>
    %246 = arith.negf %245 : vector<2x32xf32>
    %247 = math.exp %246 : vector<2x32xf32>
    %cst_51 = arith.constant 1.000000e+00 : f32
    %248 = vector.broadcast %cst_51 : f32 to vector<2x32xf32>
    %249 = arith.addf %248, %247 : vector<2x32xf32>
    %250 = arith.divf %248, %249 : vector<2x32xf32>
    %251 = vector.extract_strided_slice %244 {offsets = [0, 32], sizes = [2, 32], strides = [1, 1]} : vector<2x128xf32> to vector<2x32xf32>
    %252 = arith.negf %251 : vector<2x32xf32>
    %253 = math.exp %252 : vector<2x32xf32>
    %cst_52 = arith.constant 1.000000e+00 : f32
    %254 = vector.broadcast %cst_52 : f32 to vector<2x32xf32>
    %255 = arith.addf %254, %253 : vector<2x32xf32>
    %256 = arith.divf %254, %255 : vector<2x32xf32>
    %257 = vector.extract_strided_slice %244 {offsets = [0, 64], sizes = [2, 32], strides = [1, 1]} : vector<2x128xf32> to vector<2x32xf32>
    %258 = math.tanh %257 : vector<2x32xf32>
    %259 = vector.extract_strided_slice %244 {offsets = [0, 96], sizes = [2, 32], strides = [1, 1]} : vector<2x128xf32> to vector<2x32xf32>
    %260 = arith.negf %259 : vector<2x32xf32>
    %261 = math.exp %260 : vector<2x32xf32>
    %cst_53 = arith.constant 1.000000e+00 : f32
    %262 = vector.broadcast %cst_53 : f32 to vector<2x32xf32>
    %263 = arith.addf %262, %261 : vector<2x32xf32>
    %264 = arith.divf %262, %263 : vector<2x32xf32>
    %265 = arith.mulf %256, %241 : vector<2x32xf32>
    %266 = arith.mulf %250, %258 : vector<2x32xf32>
    %267 = arith.addf %265, %266 : vector<2x32xf32>
    %268 = math.tanh %267 : vector<2x32xf32>
    %269 = arith.mulf %264, %268 : vector<2x32xf32>
    %270 = vector.extract_strided_slice %239 {offsets = [2, 0], sizes = [2, 128], strides = [1, 1]} : vector<16x128xf32> to vector<2x128xf32>
    %cst_54 = arith.constant dense<0.000000e+00> : vector<2x128xf32>
    %271 = tpu.matmul %269, %235, %cst_54 {dimension_numbers = #tpu.dot_dimension_numbers<[1], [0], [0], [1], [0, 0, 1, 1], [], []>} : vector<2x32xf32>, vector<32x128xf32>, vector<2x128xf32> -> vector<2x128xf32>
    %272 = arith.addf %270, %271 : vector<2x128xf32>
    %273 = vector.extract_strided_slice %272 {offsets = [0, 0], sizes = [2, 32], strides = [1, 1]} : vector<2x128xf32> to vector<2x32xf32>
    %274 = arith.negf %273 : vector<2x32xf32>
    %275 = math.exp %274 : vector<2x32xf32>
    %cst_55 = arith.constant 1.000000e+00 : f32
    %276 = vector.broadcast %cst_55 : f32 to vector<2x32xf32>
    %277 = arith.addf %276, %275 : vector<2x32xf32>
    %278 = arith.divf %276, %277 : vector<2x32xf32>
    %279 = vector.extract_strided_slice %272 {offsets = [0, 32], sizes = [2, 32], strides = [1, 1]} : vector<2x128xf32> to vector<2x32xf32>
    %280 = arith.negf %279 : vector<2x32xf32>
    %281 = math.exp %280 : vector<2x32xf32>
    %cst_56 = arith.constant 1.000000e+00 : f32
    %282 = vector.broadcast %cst_56 : f32 to vector<2x32xf32>
    %283 = arith.addf %282, %281 : vector<2x32xf32>
    %284 = arith.divf %282, %283 : vector<2x32xf32>
    %285 = vector.extract_strided_slice %272 {offsets = [0, 64], sizes = [2, 32], strides = [1, 1]} : vector<2x128xf32> to vector<2x32xf32>
    %286 = math.tanh %285 : vector<2x32xf32>
    %287 = vector.extract_strided_slice %272 {offsets = [0, 96], sizes = [2, 32], strides = [1, 1]} : vector<2x128xf32> to vector<2x32xf32>
    %288 = arith.negf %287 : vector<2x32xf32>
    %289 = math.exp %288 : vector<2x32xf32>
    %cst_57 = arith.constant 1.000000e+00 : f32
    %290 = vector.broadcast %cst_57 : f32 to vector<2x32xf32>
    %291 = arith.addf %290, %289 : vector<2x32xf32>
    %292 = arith.divf %290, %291 : vector<2x32xf32>
    %293 = arith.mulf %284, %267 : vector<2x32xf32>
    %294 = arith.mulf %278, %286 : vector<2x32xf32>
    %295 = arith.addf %293, %294 : vector<2x32xf32>
    %296 = math.tanh %295 : vector<2x32xf32>
    %297 = arith.mulf %292, %296 : vector<2x32xf32>
    %298 = vector.extract_strided_slice %239 {offsets = [4, 0], sizes = [2, 128], strides = [1, 1]} : vector<16x128xf32> to vector<2x128xf32>
    %cst_58 = arith.constant dense<0.000000e+00> : vector<2x128xf32>
    %299 = tpu.matmul %297, %235, %cst_58 {dimension_numbers = #tpu.dot_dimension_numbers<[1], [0], [0], [1], [0, 0, 1, 1], [], []>} : vector<2x32xf32>, vector<32x128xf32>, vector<2x128xf32> -> vector<2x128xf32>
    %300 = arith.addf %298, %299 : vector<2x128xf32>
    %301 = vector.extract_strided_slice %300 {offsets = [0, 0], sizes = [2, 32], strides = [1, 1]} : vector<2x128xf32> to vector<2x32xf32>
    %302 = arith.negf %301 : vector<2x32xf32>
    %303 = math.exp %302 : vector<2x32xf32>
    %cst_59 = arith.constant 1.000000e+00 : f32
    %304 = vector.broadcast %cst_59 : f32 to vector<2x32xf32>
    %305 = arith.addf %304, %303 : vector<2x32xf32>
    %306 = arith.divf %304, %305 : vector<2x32xf32>
    %307 = vector.extract_strided_slice %300 {offsets = [0, 32], sizes = [2, 32], strides = [1, 1]} : vector<2x128xf32> to vector<2x32xf32>
    %308 = arith.negf %307 : vector<2x32xf32>
    %309 = math.exp %308 : vector<2x32xf32>
    %cst_60 = arith.constant 1.000000e+00 : f32
    %310 = vector.broadcast %cst_60 : f32 to vector<2x32xf32>
    %311 = arith.addf %310, %309 : vector<2x32xf32>
    %312 = arith.divf %310, %311 : vector<2x32xf32>
    %313 = vector.extract_strided_slice %300 {offsets = [0, 64], sizes = [2, 32], strides = [1, 1]} : vector<2x128xf32> to vector<2x32xf32>
    %314 = math.tanh %313 : vector<2x32xf32>
    %315 = vector.extract_strided_slice %300 {offsets = [0, 96], sizes = [2, 32], strides = [1, 1]} : vector<2x128xf32> to vector<2x32xf32>
    %316 = arith.negf %315 : vector<2x32xf32>
    %317 = math.exp %316 : vector<2x32xf32>
    %cst_61 = arith.constant 1.000000e+00 : f32
    %318 = vector.broadcast %cst_61 : f32 to vector<2x32xf32>
    %319 = arith.addf %318, %317 : vector<2x32xf32>
    %320 = arith.divf %318, %319 : vector<2x32xf32>
    %321 = arith.mulf %312, %295 : vector<2x32xf32>
    %322 = arith.mulf %306, %314 : vector<2x32xf32>
    %323 = arith.addf %321, %322 : vector<2x32xf32>
    %324 = math.tanh %323 : vector<2x32xf32>
    %325 = arith.mulf %320, %324 : vector<2x32xf32>
    %326 = vector.extract_strided_slice %239 {offsets = [6, 0], sizes = [2, 128], strides = [1, 1]} : vector<16x128xf32> to vector<2x128xf32>
    %cst_62 = arith.constant dense<0.000000e+00> : vector<2x128xf32>
    %327 = tpu.matmul %325, %235, %cst_62 {dimension_numbers = #tpu.dot_dimension_numbers<[1], [0], [0], [1], [0, 0, 1, 1], [], []>} : vector<2x32xf32>, vector<32x128xf32>, vector<2x128xf32> -> vector<2x128xf32>
    %328 = arith.addf %326, %327 : vector<2x128xf32>
    %329 = vector.extract_strided_slice %328 {offsets = [0, 0], sizes = [2, 32], strides = [1, 1]} : vector<2x128xf32> to vector<2x32xf32>
    %330 = arith.negf %329 : vector<2x32xf32>
    %331 = math.exp %330 : vector<2x32xf32>
    %cst_63 = arith.constant 1.000000e+00 : f32
    %332 = vector.broadcast %cst_63 : f32 to vector<2x32xf32>
    %333 = arith.addf %332, %331 : vector<2x32xf32>
    %334 = arith.divf %332, %333 : vector<2x32xf32>
    %335 = vector.extract_strided_slice %328 {offsets = [0, 32], sizes = [2, 32], strides = [1, 1]} : vector<2x128xf32> to vector<2x32xf32>
    %336 = arith.negf %335 : vector<2x32xf32>
    %337 = math.exp %336 : vector<2x32xf32>
    %cst_64 = arith.constant 1.000000e+00 : f32
    %338 = vector.broadcast %cst_64 : f32 to vector<2x32xf32>
    %339 = arith.addf %338, %337 : vector<2x32xf32>
    %340 = arith.divf %338, %339 : vector<2x32xf32>
    %341 = vector.extract_strided_slice %328 {offsets = [0, 64], sizes = [2, 32], strides = [1, 1]} : vector<2x128xf32> to vector<2x32xf32>
    %342 = math.tanh %341 : vector<2x32xf32>
    %343 = vector.extract_strided_slice %328 {offsets = [0, 96], sizes = [2, 32], strides = [1, 1]} : vector<2x128xf32> to vector<2x32xf32>
    %344 = arith.negf %343 : vector<2x32xf32>
    %345 = math.exp %344 : vector<2x32xf32>
    %cst_65 = arith.constant 1.000000e+00 : f32
    %346 = vector.broadcast %cst_65 : f32 to vector<2x32xf32>
    %347 = arith.addf %346, %345 : vector<2x32xf32>
    %348 = arith.divf %346, %347 : vector<2x32xf32>
    %349 = arith.mulf %340, %323 : vector<2x32xf32>
    %350 = arith.mulf %334, %342 : vector<2x32xf32>
    %351 = arith.addf %349, %350 : vector<2x32xf32>
    %352 = math.tanh %351 : vector<2x32xf32>
    %353 = arith.mulf %348, %352 : vector<2x32xf32>
    %354 = vector.extract_strided_slice %239 {offsets = [8, 0], sizes = [2, 128], strides = [1, 1]} : vector<16x128xf32> to vector<2x128xf32>
    %cst_66 = arith.constant dense<0.000000e+00> : vector<2x128xf32>
    %355 = tpu.matmul %353, %235, %cst_66 {dimension_numbers = #tpu.dot_dimension_numbers<[1], [0], [0], [1], [0, 0, 1, 1], [], []>} : vector<2x32xf32>, vector<32x128xf32>, vector<2x128xf32> -> vector<2x128xf32>
    %356 = arith.addf %354, %355 : vector<2x128xf32>
    %357 = vector.extract_strided_slice %356 {offsets = [0, 0], sizes = [2, 32], strides = [1, 1]} : vector<2x128xf32> to vector<2x32xf32>
    %358 = arith.negf %357 : vector<2x32xf32>
    %359 = math.exp %358 : vector<2x32xf32>
    %cst_67 = arith.constant 1.000000e+00 : f32
    %360 = vector.broadcast %cst_67 : f32 to vector<2x32xf32>
    %361 = arith.addf %360, %359 : vector<2x32xf32>
    %362 = arith.divf %360, %361 : vector<2x32xf32>
    %363 = vector.extract_strided_slice %356 {offsets = [0, 32], sizes = [2, 32], strides = [1, 1]} : vector<2x128xf32> to vector<2x32xf32>
    %364 = arith.negf %363 : vector<2x32xf32>
    %365 = math.exp %364 : vector<2x32xf32>
    %cst_68 = arith.constant 1.000000e+00 : f32
    %366 = vector.broadcast %cst_68 : f32 to vector<2x32xf32>
    %367 = arith.addf %366, %365 : vector<2x32xf32>
    %368 = arith.divf %366, %367 : vector<2x32xf32>
    %369 = vector.extract_strided_slice %356 {offsets = [0, 64], sizes = [2, 32], strides = [1, 1]} : vector<2x128xf32> to vector<2x32xf32>
    %370 = math.tanh %369 : vector<2x32xf32>
    %371 = vector.extract_strided_slice %356 {offsets = [0, 96], sizes = [2, 32], strides = [1, 1]} : vector<2x128xf32> to vector<2x32xf32>
    %372 = arith.negf %371 : vector<2x32xf32>
    %373 = math.exp %372 : vector<2x32xf32>
    %cst_69 = arith.constant 1.000000e+00 : f32
    %374 = vector.broadcast %cst_69 : f32 to vector<2x32xf32>
    %375 = arith.addf %374, %373 : vector<2x32xf32>
    %376 = arith.divf %374, %375 : vector<2x32xf32>
    %377 = arith.mulf %368, %351 : vector<2x32xf32>
    %378 = arith.mulf %362, %370 : vector<2x32xf32>
    %379 = arith.addf %377, %378 : vector<2x32xf32>
    %380 = math.tanh %379 : vector<2x32xf32>
    %381 = arith.mulf %376, %380 : vector<2x32xf32>
    %382 = vector.extract_strided_slice %239 {offsets = [10, 0], sizes = [2, 128], strides = [1, 1]} : vector<16x128xf32> to vector<2x128xf32>
    %cst_70 = arith.constant dense<0.000000e+00> : vector<2x128xf32>
    %383 = tpu.matmul %381, %235, %cst_70 {dimension_numbers = #tpu.dot_dimension_numbers<[1], [0], [0], [1], [0, 0, 1, 1], [], []>} : vector<2x32xf32>, vector<32x128xf32>, vector<2x128xf32> -> vector<2x128xf32>
    %384 = arith.addf %382, %383 : vector<2x128xf32>
    %385 = vector.extract_strided_slice %384 {offsets = [0, 0], sizes = [2, 32], strides = [1, 1]} : vector<2x128xf32> to vector<2x32xf32>
    %386 = arith.negf %385 : vector<2x32xf32>
    %387 = math.exp %386 : vector<2x32xf32>
    %cst_71 = arith.constant 1.000000e+00 : f32
    %388 = vector.broadcast %cst_71 : f32 to vector<2x32xf32>
    %389 = arith.addf %388, %387 : vector<2x32xf32>
    %390 = arith.divf %388, %389 : vector<2x32xf32>
    %391 = vector.extract_strided_slice %384 {offsets = [0, 32], sizes = [2, 32], strides = [1, 1]} : vector<2x128xf32> to vector<2x32xf32>
    %392 = arith.negf %391 : vector<2x32xf32>
    %393 = math.exp %392 : vector<2x32xf32>
    %cst_72 = arith.constant 1.000000e+00 : f32
    %394 = vector.broadcast %cst_72 : f32 to vector<2x32xf32>
    %395 = arith.addf %394, %393 : vector<2x32xf32>
    %396 = arith.divf %394, %395 : vector<2x32xf32>
    %397 = vector.extract_strided_slice %384 {offsets = [0, 64], sizes = [2, 32], strides = [1, 1]} : vector<2x128xf32> to vector<2x32xf32>
    %398 = math.tanh %397 : vector<2x32xf32>
    %399 = vector.extract_strided_slice %384 {offsets = [0, 96], sizes = [2, 32], strides = [1, 1]} : vector<2x128xf32> to vector<2x32xf32>
    %400 = arith.negf %399 : vector<2x32xf32>
    %401 = math.exp %400 : vector<2x32xf32>
    %cst_73 = arith.constant 1.000000e+00 : f32
    %402 = vector.broadcast %cst_73 : f32 to vector<2x32xf32>
    %403 = arith.addf %402, %401 : vector<2x32xf32>
    %404 = arith.divf %402, %403 : vector<2x32xf32>
    %405 = arith.mulf %396, %379 : vector<2x32xf32>
    %406 = arith.mulf %390, %398 : vector<2x32xf32>
    %407 = arith.addf %405, %406 : vector<2x32xf32>
    %408 = math.tanh %407 : vector<2x32xf32>
    %409 = arith.mulf %404, %408 : vector<2x32xf32>
    %410 = vector.extract_strided_slice %239 {offsets = [12, 0], sizes = [2, 128], strides = [1, 1]} : vector<16x128xf32> to vector<2x128xf32>
    %cst_74 = arith.constant dense<0.000000e+00> : vector<2x128xf32>
    %411 = tpu.matmul %409, %235, %cst_74 {dimension_numbers = #tpu.dot_dimension_numbers<[1], [0], [0], [1], [0, 0, 1, 1], [], []>} : vector<2x32xf32>, vector<32x128xf32>, vector<2x128xf32> -> vector<2x128xf32>
    %412 = arith.addf %410, %411 : vector<2x128xf32>
    %413 = vector.extract_strided_slice %412 {offsets = [0, 0], sizes = [2, 32], strides = [1, 1]} : vector<2x128xf32> to vector<2x32xf32>
    %414 = arith.negf %413 : vector<2x32xf32>
    %415 = math.exp %414 : vector<2x32xf32>
    %cst_75 = arith.constant 1.000000e+00 : f32
    %416 = vector.broadcast %cst_75 : f32 to vector<2x32xf32>
    %417 = arith.addf %416, %415 : vector<2x32xf32>
    %418 = arith.divf %416, %417 : vector<2x32xf32>
    %419 = vector.extract_strided_slice %412 {offsets = [0, 32], sizes = [2, 32], strides = [1, 1]} : vector<2x128xf32> to vector<2x32xf32>
    %420 = arith.negf %419 : vector<2x32xf32>
    %421 = math.exp %420 : vector<2x32xf32>
    %cst_76 = arith.constant 1.000000e+00 : f32
    %422 = vector.broadcast %cst_76 : f32 to vector<2x32xf32>
    %423 = arith.addf %422, %421 : vector<2x32xf32>
    %424 = arith.divf %422, %423 : vector<2x32xf32>
    %425 = vector.extract_strided_slice %412 {offsets = [0, 64], sizes = [2, 32], strides = [1, 1]} : vector<2x128xf32> to vector<2x32xf32>
    %426 = math.tanh %425 : vector<2x32xf32>
    %427 = vector.extract_strided_slice %412 {offsets = [0, 96], sizes = [2, 32], strides = [1, 1]} : vector<2x128xf32> to vector<2x32xf32>
    %428 = arith.negf %427 : vector<2x32xf32>
    %429 = math.exp %428 : vector<2x32xf32>
    %cst_77 = arith.constant 1.000000e+00 : f32
    %430 = vector.broadcast %cst_77 : f32 to vector<2x32xf32>
    %431 = arith.addf %430, %429 : vector<2x32xf32>
    %432 = arith.divf %430, %431 : vector<2x32xf32>
    %433 = arith.mulf %424, %407 : vector<2x32xf32>
    %434 = arith.mulf %418, %426 : vector<2x32xf32>
    %435 = arith.addf %433, %434 : vector<2x32xf32>
    %436 = math.tanh %435 : vector<2x32xf32>
    %437 = arith.mulf %432, %436 : vector<2x32xf32>
    %438 = vector.extract_strided_slice %239 {offsets = [14, 0], sizes = [2, 128], strides = [1, 1]} : vector<16x128xf32> to vector<2x128xf32>
    %cst_78 = arith.constant dense<0.000000e+00> : vector<2x128xf32>
    %439 = tpu.matmul %437, %235, %cst_78 {dimension_numbers = #tpu.dot_dimension_numbers<[1], [0], [0], [1], [0, 0, 1, 1], [], []>} : vector<2x32xf32>, vector<32x128xf32>, vector<2x128xf32> -> vector<2x128xf32>
    %440 = arith.addf %438, %439 : vector<2x128xf32>
    %441 = vector.extract_strided_slice %440 {offsets = [0, 0], sizes = [2, 32], strides = [1, 1]} : vector<2x128xf32> to vector<2x32xf32>
    %442 = arith.negf %441 : vector<2x32xf32>
    %443 = math.exp %442 : vector<2x32xf32>
    %cst_79 = arith.constant 1.000000e+00 : f32
    %444 = vector.broadcast %cst_79 : f32 to vector<2x32xf32>
    %445 = arith.addf %444, %443 : vector<2x32xf32>
    %446 = arith.divf %444, %445 : vector<2x32xf32>
    %447 = vector.extract_strided_slice %440 {offsets = [0, 32], sizes = [2, 32], strides = [1, 1]} : vector<2x128xf32> to vector<2x32xf32>
    %448 = arith.negf %447 : vector<2x32xf32>
    %449 = math.exp %448 : vector<2x32xf32>
    %cst_80 = arith.constant 1.000000e+00 : f32
    %450 = vector.broadcast %cst_80 : f32 to vector<2x32xf32>
    %451 = arith.addf %450, %449 : vector<2x32xf32>
    %452 = arith.divf %450, %451 : vector<2x32xf32>
    %453 = vector.extract_strided_slice %440 {offsets = [0, 64], sizes = [2, 32], strides = [1, 1]} : vector<2x128xf32> to vector<2x32xf32>
    %454 = math.tanh %453 : vector<2x32xf32>
    %455 = vector.extract_strided_slice %440 {offsets = [0, 96], sizes = [2, 32], strides = [1, 1]} : vector<2x128xf32> to vector<2x32xf32>
    %456 = arith.negf %455 : vector<2x32xf32>
    %457 = math.exp %456 : vector<2x32xf32>
    %cst_81 = arith.constant 1.000000e+00 : f32
    %458 = vector.broadcast %cst_81 : f32 to vector<2x32xf32>
    %459 = arith.addf %458, %457 : vector<2x32xf32>
    %460 = arith.divf %458, %459 : vector<2x32xf32>
    %461 = arith.mulf %452, %435 : vector<2x32xf32>
    %462 = arith.mulf %446, %454 : vector<2x32xf32>
    %463 = arith.addf %461, %462 : vector<2x32xf32>
    %464 = math.tanh %463 : vector<2x32xf32>
    %465 = arith.mulf %460, %464 : vector<2x32xf32>
    %c0_82 = arith.constant 0 : index
    %c0_83 = arith.constant 0 : index
    %466 = vector.load %arg7[%c0_82, %c0_83] : memref<32x4xf32, #tpu.memory_space<vmem>>, vector<32x4xf32>
    %cst_84 = arith.constant dense<0.000000e+00> : vector<2x4xf32>
    %467 = tpu.matmul %465, %466, %cst_84 {dimension_numbers = #tpu.dot_dimension_numbers<[1], [0], [0], [1], [0, 0, 1, 1], [], []>} : vector<2x32xf32>, vector<32x4xf32>, vector<2x4xf32> -> vector<2x4xf32>
    %c0_85 = arith.constant 0 : index
    %c0_86 = arith.constant 0 : index
    %468 = vector.load %arg8[%c0_85, %c0_86] : memref<1x4xf32, #tpu.memory_space<vmem>>, vector<1x4xf32>
    %469 = vector.broadcast %468 : vector<1x4xf32> to vector<2x4xf32>
    %470 = arith.addf %467, %469 : vector<2x4xf32>
    %c0_87 = arith.constant 0 : index
    %c0_88 = arith.constant 0 : index
    %471 = vector.load %arg9[%c0_87, %c0_88] : memref<2x4xf32, #tpu.memory_space<vmem>>, vector<2x4xf32>
    tpu.vector_store %arg9[%c0_87, %c0_88], %470 {strides = array<i32>} : memref<2x4xf32, #tpu.memory_space<vmem>>, vector<2x4xf32>,
    return
  }
}

</mosaic_0001>

<bundles_post_ra>
// kernel: simple_lstm_forward.1
= control target key start
LH: loop header
LB: loop body
LE: loop exit
PB: predicated region body
PF: predicated region fallthrough
CT: control target
= control target key end

     0   :  { %14 = vsyncpa [#allocation3], 0  ;;  %s3058_s0 = inlined_call_operand.vmem [shape: f32[16,16], index: 0, kind: input, shape index: {}]   ;;  %s3059_s1 = inlined_call_operand.vmem [shape: f32[16,128], index: 1, kind: input, shape index: {}]   ;;  %s3060_s2 = inlined_call_operand.vmem [shape: f32[32,128], index: 2, kind: input, shape index: {}]   ;;  %s3061_s3 = inlined_call_operand.hbm [shape: f32[1,128], index: 3, kind: input, shape index: {}]   ;;  %s3062_s4 = inlined_call_operand.vmem [shape: f32[32,128], index: 4, kind: input, shape index: {}]   ;;  %s3063_s5 = inlined_call_operand.hbm [shape: f32[32,128], index: 5, kind: input, shape index: {}]   ;;  %s3064_s6 = inlined_call_operand.vmem [shape: f32[1,128], index: 6, kind: input, shape index: {}]   ;;  %s3065_s7 = inlined_call_operand.vmem [shape: f32[32,4], index: 7, kind: input, shape index: {}]   ;;  %s3066_s8 = inlined_call_operand.hbm [shape: f32[1,4], index: 8, kind: input, shape index: {}]   ;;  %s3067_s9 = inlined_call_operand.hbm [shape: f32[2,4], index: 9, kind: output, shape index: {}]  }
   0x1   :  { %15 = vsyncpa [#allocation6], 0 }
   0x2   :  { %16 = vsyncpa [#allocation4], 0  ;;  %s2625_s30 = smov [#allocation5]  }
   0x3   :  { %s40_s10 = sshll.u32 %s2625_s30, 4  ;;  %s41_s10 = int_to_ptr.vmem [resolvable:$true] %s40_s10 }
   0x4   :  { %s2547_s11 = scalar_lea.vmem %s41_s10, 512  ;;  %p2552_p1 = scmp.lt.s32.totalorder %s41_s10, %s41_s10 }
   0x5   :  { %p2548_p0 = scmp.ne.s32.totalorder %s41_s10, %s2547_s11  ;;  %p2553_p2 = scmp.lt.s32.totalorder %s2547_s11, %s2547_s11 }
   0x7   :  { %p2554_p3 = por %p2553_p2, %p2552_p1 }
   0x9   :  { %p2555_p4 = pnand %p2554_p3, %p2548_p0 }
   0xb   :  { %2558 = shalt.err (!%p2555_p4)
}
   0xc   :  { %s2626_s12 = smov 128   ;;  %s2627_s13 = smov 8  }
   0xd   :  { %46 = dma.hbm_to_vmem [thread:$0]  %s3063_s5, 512, %s41_s10, [#allocation6], %s2626_s12, %s2626_s12, %s2627_s13  }
   0xe   :  { %s2628_s16 = smov [#allocation2]   ;;  %s2629_s18 = smov [#allocation7]  }
   0xf   :  { %s29_s17 = sshll.u32 %s2628_s16, 4  ;;  %s57_s19 = sshll.u32 %s2629_s18, 4  ;;  %s30_s17 = int_to_ptr.vmem [resolvable:$true] %s29_s17  ;;  %s58_s19 = int_to_ptr.vmem [resolvable:$true] %s57_s19 }
  0x10   :  { %s2567_s20 = scalar_lea.vmem %s30_s17, 16  ;;  %s2571_s21 = scalar_lea.vmem %s30_s17, 32 }
  0x11   :  { %p2568_p5 = scmp.ne.s32.totalorder %s30_s17, %s2567_s20  ;;  %p2572_p6 = scmp.lt.s32.totalorder %s30_s17, %s30_s17 }
  0x12   :  { %p2573_p7 = scmp.lt.s32.totalorder %s2571_s21, %s2567_s20 }
  0x14   :  { %p2574_p8 = por %p2573_p7, %p2572_p6 }
  0x16   :  { %p2575_p9 = pnand %p2574_p8, %p2568_p5 }
  0x18   :  { %2578 = shalt.err (!%p2575_p9)
}
  0x19   :  { %32 = dma.hbm_to_vmem [thread:$0]  %s3061_s3, 16, %s30_s17, [#allocation3]  }
  0x1a   :  { %s2587_s24 = scalar_lea.vmem %s58_s19, 16  ;;  %s2591_s5 = scalar_lea.vmem %s58_s19, 32 }
  0x1b   :  { %p2588_p10 = scmp.ne.s32.totalorder %s58_s19, %s2587_s24  ;;  %p2592_p11 = scmp.lt.s32.totalorder %s58_s19, %s58_s19 }
  0x1c   :  { %p2593_p12 = scmp.lt.s32.totalorder %s2591_s5, %s2587_s24 }
  0x1e   :  { %p2594_p13 = por %p2593_p12, %p2592_p11 }
  0x20   :  { %p2595_p0 = pnand %p2594_p13, %p2588_p10 }
  0x22   :  { %2598 = shalt.err (!%p2595_p0)
}
  0x23   :  { %60 = dma.hbm_to_vmem [thread:$0]  %s3066_s8, 16, %s58_s19, [#allocation6]  }
  0x24   :  { %2619 = dma.done.wait [#allocation3], 16  }
  0x25   :  { %2620 = vsyncadd [#allocation3], 4294967280 }
  0x26   :  { %2621 = dma.done.wait [#allocation6], 528  }
  0x27   :  { %2622 = vsyncadd [#allocation6], 4294966768  ;;  %v2630_v0 = vmov 0.0   ;;  %vm2631_vm0 = vmmov 0   ;;  %v73_v1 = vld [vmem:[%s3059_s1 + $0x8] sm:$0xff]  ;;  %v2703_v2 = vld [vmem:[%s3060_s2 + $0x18] sm:$0xff] }
  0x28   :  { %2203 = vmatprep.subr.mxu1 %v2630_v0  ;;  %2211 = vmatprep.mubr.msk.f32.mxu1 %vm2631_vm0, %v2630_v0  ;;  %v72_v3 = vld [vmem:[%s3059_s1] sm:$0xff]  ;;  %v2712_v4 = vld [vmem:[%s3060_s2 + $0x10] sm:$0xff]  ;;  %vm85_vm1 = vcmask 130048   ;;  %v71_v6 = vld [vmem:[%s3058_s0 + $0x8] sm:$0xff]  ;;  %vm167_vm2 = vcmask 261120   ;;  %vm1010_vm3 = vcmask 1041408  }
  0x29   :  { %2196 = vmatprep.subr.mxu0 %v73_v1  ;;  %2204 = vmatpush3.msra.mxu1 %v2703_v2  ;;  %v70_v5 = vld [vmem:[%s3058_s0] sm:$0xff]  ;;  %v2725_v7 = vld [vmem:[%s3060_s2 + $0x8] sm:$0xff]  ;;  %s2632_s0 = smov 64   ;;  %vm1012_vm4 = vcmask 1043456   ;;  %vm1014_vm5 = vcmask 1045504   ;;  %s2634_s11 = smov [#allocation8]  }
  0x2a   :  { %2197 = vmatpush3.msra.mxu0 %v73_v1  ;;  %2205 = vmatprep.subr.mxu1 %v2630_v0  ;;  %v2731_v8 = vld [vmem:[%s3060_s2] sm:$0xff]  ;;  %s2633_s2 = smov 32   ;;  %s2053_s12 = sshll.u32 %s2634_s11, 4  ;;  %vm2045_vm6 = vcmask 25600   ;;  %s2054_s12 = int_to_ptr.vmem [resolvable:$true] %s2053_s12 }
  0x2b   :  { %2198 = vmatprep.subr.mxu0 %v72_v3  ;;  %2206 = vmatpush3.msra.mxu1 %v2712_v4  ;;  %v2063_v9 = vld [vmem:[#allocation2] ss:$0 sm:$0xff]  ;;  %p2604_p2 = scmp.lt.s32.totalorder %s2054_s12, %s2054_s12 }
  0x2c   :  { %2199 = vmatpush3.msra.mxu0 %v72_v3  ;;  %2200 = vmatprep.mubr.msk.f32.mxu0 %vm85_vm1, %v70_v5 }
  0x2d   :  { %2207 = vmatprep.subr.mxu1 %v2630_v0  ;;  %2201 = vmatmul.mubr.msk.f32.vlgmr.msra.gmra.mxu0 %vm85_vm1, %v71_v6 }
  0x2e   :  { %2208 = vmatpush3.msra.mxu1 %v2725_v7  ;;  %2214 = vmatprep.subr.mxu0 %v2630_v0 }
  0x2f   :  { %2209 = vmatprep.subr.mxu1 %v2630_v0  ;;  %2215 = vmatpush3.msra.mxu0 %v2703_v2 }
  0x30   :  { %2210 = vmatpush3.msra.mxu1 %v2731_v8  ;;  %2216 = vmatprep.subr.mxu0 %v2630_v0 }
  0x31   :  { %2212 = vmatmul.mubr.f32.vlgmr.msra.gmra.mxu1 %v2630_v0  ;;  %2217 = vmatpush3.msra.mxu0 %v2712_v4 }
  0x32   :  { %2218 = vmatprep.subr.mxu0 %v2630_v0  ;;  %2222 = vmatprep.mubr.msk.f32.mxu0 %vm2631_vm0, %v2630_v0 }
  0x33   :  { %2219 = vmatpush3.msra.mxu0 %v2725_v7  ;;  %2225 = vmatprep.subr.mxu1 %v2630_v0 }
  0x34   :  { %2220 = vmatprep.subr.mxu0 %v2630_v0  ;;  %2226 = vmatpush3.msra.mxu1 %v2703_v2 }
  0x35   :  { %2221 = vmatpush3.msra.mxu0 %v2731_v8  ;;  %2227 = vmatprep.subr.mxu1 %v2630_v0 }
  0x36   :  { %2228 = vmatpush3.msra.mxu1 %v2712_v4  ;;  %2233 = vmatprep.mubr.msk.f32.mxu1 %vm2631_vm0, %v2630_v0 }
  0x37   :  { %2229 = vmatprep.subr.mxu1 %v2630_v0  ;;  %2236 = vmatprep.subr.mxu0 %v2630_v0 }
  0x38   :  { %2230 = vmatpush3.msra.mxu1 %v2725_v7 }
  0x39   :  { %2231 = vmatprep.subr.mxu1 %v2630_v0 }
  0x3a   :  { %2232 = vmatpush3.msra.mxu1 %v2731_v8 }
  0x3b   :  { %2247 = vmatprep.subr.mxu1 %v2630_v0 }
  0xed   :  { %v2202_v10 = vpop.f32.mrf.mxu0 }
  0xee   :  { %v2759_v11 = vadd.f32 %v2202_v10, %v2063_v9 }
  0xef   :  { %v158_v12 = vpop.f32.mrf.mxu0 }
  0xf0   :  { %v2761_v13 = vadd.f32 %v2063_v9, %v158_v12 }
  0xf1   :  { %v237_v14 = vpop.f32.mrf.mxu1 }
  0xf2   :  { %v241_v15 = vadd.f32 %v237_v14, %v2761_v13 }
  0xf3   :  { %v2213_v16 = vpop.f32.mrf.mxu1 }
  0xf4   :  { %2411 = vtanh.f32 %v241_v15  ;;  %v2066_v18 = vmul.f32 -1.442695, %v241_v15 }
  0xf6   :  { %2413 = vpow2.f32 %v2066_v18 }
 0x101   :  { %v2412_v17 = vpop.eup %2411 }
 0x102   :  { %251 = vrot.lane.b32.xlu0 %v2412_v17, %s2632_s0 }
 0x103   :  { %v2414_v19 = vpop.eup %2413 }
 0x104   :  { %v245_v20 = vadd.f32 1.0, %v2414_v19 }
 0x106   :  { %2415 = vrcp.f32 %v245_v20 }
 0x113   :  { %v2416_v21 = vpop.eup %2415 }
 0x114   :  { %v249_v24 = vmul.f32 0.0, %v2416_v21 }
 0x174   :  { %v252_v22 = vpop.permute.xlu0 %251 }
 0x175   :  { %v254_v23 = vmul.f32 %v2416_v21, %v252_v22 }
 0x177   :  { %256 = vrot.lane.b32.xlu0 %v254_v23, %s2633_s2 }
 0x1e9   :  { %v257_v25 = vpop.permute.xlu0 %256 }
 0x1ea   :  { %v259_v26 = vadd.f32 %v257_v25, %v249_v24 }
 0x1ec   :  { %2417 = vtanh.f32 %v259_v26  ;;  %v353_v42 = vrot.slane %v259_v26, 6 }
 0x1f9   :  { %v2418_v27 = vpop.eup %2417 }
 0x1fa   :  { %262 = vrot.lane.b32.xlu1 %v2418_v27, %s2632_s0 }
 0x26c   :  { %v263_v28 = vpop.permute.xlu1 %262 }
 0x26d   :  { %v2767_v29 = vmul.f32 %v2416_v21, %v263_v28 }
 0x26f   :  { %267 = vrot.lane.b32.xlu1 %v2767_v29, %s2633_s2 }
 0x2e1   :  { %v268_v30 = vpop.permute.xlu1 %267 }
 0x2e2   :  { %2223 = vmatmul.mubr.msk.f32.vlgmr.msra.gmra.mxu0 %vm167_vm2, %v268_v30 }
 0x2e3   :  { %2237 = vmatpush3.msra.mxu0 %v2703_v2  ;;  %2244 = vmatprep.mubr.msk.f32.mxu0 %vm2631_vm0, %v2630_v0 }
 0x2e4   :  { %2238 = vmatprep.subr.mxu0 %v2630_v0 }
 0x2e5   :  { %2239 = vmatpush3.msra.mxu0 %v2712_v4 }
 0x2e6   :  { %2240 = vmatprep.subr.mxu0 %v2630_v0 }
 0x2e7   :  { %2241 = vmatpush3.msra.mxu0 %v2725_v7 }
 0x2e8   :  { %2242 = vmatprep.subr.mxu0 %v2630_v0 }
 0x2e9   :  { %2243 = vmatpush3.msra.mxu0 %v2731_v8 }
 0x2ea   :  { %2258 = vmatprep.subr.mxu0 %v2630_v0 }
 0x3a2   :  { %v337_v31 = vpop.f32.mrf.mxu0 }
 0x3a3   :  { %v342_v32 = vrot.slane %v337_v31, 6 }
 0x3a4   :  { %v2224_v33 = vpop.f32.mrf.mxu0 }
 0x3a5   :  { %v344_v34 = vadd.f32 %v342_v32, %v2761_v13 }
 0x3a7   :  { %2419 = vtanh.f32 %v344_v34  ;;  %v2068_v36 = vmul.f32 -1.442695, %v344_v34 }
 0x3a9   :  { %2421 = vpow2.f32 %v2068_v36 }
 0x3b4   :  { %v2420_v35 = vpop.eup %2419 }
 0x3b5   :  { %357 = vrot.lane.b32.xlu0 %v2420_v35, %s2632_s0 }
 0x3b6   :  { %v2422_v37 = vpop.eup %2421 }
 0x3b7   :  { %v348_v38 = vadd.f32 1.0, %v2422_v37 }
 0x3b9   :  { %2423 = vrcp.f32 %v348_v38 }
 0x3c6   :  { %v2424_v39 = vpop.eup %2423 }
 0x3c7   :  { %v355_v43 = vmul.f32 %v2424_v39, %v353_v42 }
 0x427   :  { %v358_v40 = vpop.permute.xlu0 %357 }
 0x428   :  { %v360_v41 = vmul.f32 %v2424_v39, %v358_v40 }
 0x42a   :  { %362 = vrot.lane.b32.xlu1 %v360_v41, %s2633_s2 }
 0x49c   :  { %v363_v44 = vpop.permute.xlu1 %362 }
 0x49d   :  { %v365_v45 = vadd.f32 %v363_v44, %v355_v43 }
 0x49f   :  { %2425 = vtanh.f32 %v365_v45  ;;  %v460_v62 = vrot.slane %v365_v45, 6 }
 0x4ac   :  { %v2426_v46 = vpop.eup %2425 }
 0x4ad   :  { %368 = vrot.lane.b32.xlu0 %v2426_v46, %s2632_s0 }
 0x51f   :  { %v369_v47 = vpop.permute.xlu0 %368 }
 0x520   :  { %v371_v48 = vmul.f32 %v2424_v39, %v369_v47 }
 0x522   :  { %v373_v49 = vrot.slane %v371_v48, 2  ;;  %v1011_v10 = vsel %vm1010_vm3, %v2767_v29, %v371_v48 }
 0x524   :  { %374 = vrot.lane.b32.xlu1 %v373_v49, %s2633_s2 }
 0x596   :  { %v375_v50 = vpop.permute.xlu1 %374 }
 0x597   :  { %2234 = vmatmul.mubr.msk.f32.vlgmr.msra.gmra.mxu1 %vm167_vm2, %v375_v50 }
 0x598   :  { %2248 = vmatpush3.msra.mxu1 %v2703_v2  ;;  %2255 = vmatprep.mubr.msk.f32.mxu1 %vm2631_vm0, %v2630_v0 }
 0x599   :  { %2249 = vmatprep.subr.mxu1 %v2630_v0 }
 0x59a   :  { %2250 = vmatpush3.msra.mxu1 %v2712_v4 }
 0x59b   :  { %2251 = vmatprep.subr.mxu1 %v2630_v0 }
 0x59c   :  { %2252 = vmatpush3.msra.mxu1 %v2725_v7 }
 0x59d   :  { %2253 = vmatprep.subr.mxu1 %v2630_v0 }
 0x59e   :  { %2254 = vmatpush3.msra.mxu1 %v2731_v8 }
 0x59f   :  { %2269 = vmatprep.subr.mxu1 %v2630_v0 }
 0x657   :  { %v444_v51 = vpop.f32.mrf.mxu1 }
 0x658   :  { %v449_v52 = vrot.slane %v444_v51, 4 }
 0x659   :  { %v2235_v53 = vpop.f32.mrf.mxu1 }
 0x65a   :  { %v451_v54 = vadd.f32 %v449_v52, %v2761_v13 }
 0x65c   :  { %2427 = vtanh.f32 %v451_v54  ;;  %v2070_v56 = vmul.f32 -1.442695, %v451_v54 }
 0x65e   :  { %2429 = vpow2.f32 %v2070_v56 }
 0x669   :  { %v2428_v55 = vpop.eup %2427 }
 0x66a   :  { %464 = vrot.lane.b32.xlu0 %v2428_v55, %s2632_s0 }
 0x66b   :  { %v2430_v57 = vpop.eup %2429 }
 0x66c   :  { %v455_v58 = vadd.f32 1.0, %v2430_v57 }
 0x66e   :  { %2431 = vrcp.f32 %v455_v58 }
 0x67b   :  { %v2432_v59 = vpop.eup %2431 }
 0x67c   :  { %v462_v63 = vmul.f32 %v2432_v59, %v460_v62 }
 0x6dc   :  { %v465_v60 = vpop.permute.xlu0 %464 }
 0x6dd   :  { %v467_v61 = vmul.f32 %v2432_v59, %v465_v60 }
 0x6df   :  { %469 = vrot.lane.b32.xlu1 %v467_v61, %s2633_s2 }
 0x751   :  { %v470_v1 = vpop.permute.xlu1 %469 }
 0x752   :  { %v472_v3 = vadd.f32 %v470_v1, %v462_v63 }
 0x754   :  { %2433 = vtanh.f32 %v472_v3  ;;  %v567_v27 = vrot.slane %v472_v3, 6 }
 0x761   :  { %v2434_v5 = vpop.eup %2433 }
 0x762   :  { %475 = vrot.lane.b32.xlu0 %v2434_v5, %s2632_s0 }
 0x7d4   :  { %v476_v6 = vpop.permute.xlu0 %475 }
 0x7d5   :  { %v478_v9 = vmul.f32 %v2432_v59, %v476_v6 }
 0x7d7   :  { %v480_v12 = vrot.slane %v478_v9, 4  ;;  %v1013_v14 = vsel %vm1012_vm4, %v1011_v10, %v478_v9 }
 0x7d9   :  { %481 = vrot.lane.b32.xlu1 %v480_v12, %s2633_s2 }
 0x84b   :  { %v482_v15 = vpop.permute.xlu1 %481 }
 0x84c   :  { %2245 = vmatmul.mubr.msk.f32.vlgmr.msra.gmra.mxu0 %vm167_vm2, %v482_v15 }
 0x84d   :  { %2259 = vmatpush3.msra.mxu0 %v2703_v2  ;;  %2266 = vmatprep.mubr.msk.f32.mxu0 %vm2631_vm0, %v2630_v0 }
 0x84e   :  { %2260 = vmatprep.subr.mxu0 %v2630_v0 }
 0x84f   :  { %2261 = vmatpush3.msra.mxu0 %v2712_v4 }
 0x850   :  { %2262 = vmatprep.subr.mxu0 %v2630_v0 }
 0x851   :  { %2263 = vmatpush3.msra.mxu0 %v2725_v7 }
 0x852   :  { %2264 = vmatprep.subr.mxu0 %v2630_v0 }
 0x853   :  { %2265 = vmatpush3.msra.mxu0 %v2731_v8 }
 0x854   :  { %2280 = vmatprep.subr.mxu0 %v2630_v0 }
 0x90c   :  { %v551_v16 = vpop.f32.mrf.mxu0 }
 0x90d   :  { %v556_v17 = vrot.slane %v551_v16, 2 }
 0x90e   :  { %v2246_v18 = vpop.f32.mrf.mxu0 }
 0x90f   :  { %v558_v19 = vadd.f32 %v556_v17, %v2761_v13 }
 0x911   :  { %2435 = vtanh.f32 %v558_v19  ;;  %v2072_v21 = vmul.f32 -1.442695, %v558_v19 }
 0x913   :  { %2437 = vpow2.f32 %v2072_v21 }
 0x91e   :  { %v2436_v20 = vpop.eup %2435 }
 0x91f   :  { %571 = vrot.lane.b32.xlu0 %v2436_v20, %s2632_s0 }
 0x920   :  { %v2438_v22 = vpop.eup %2437 }
 0x921   :  { %v562_v23 = vadd.f32 1.0, %v2438_v22 }
 0x923   :  { %2439 = vrcp.f32 %v562_v23 }
 0x930   :  { %v2440_v24 = vpop.eup %2439 }
 0x931   :  { %v569_v28 = vmul.f32 %v2440_v24, %v567_v27 }
 0x991   :  { %v572_v25 = vpop.permute.xlu0 %571 }
 0x992   :  { %v574_v26 = vmul.f32 %v2440_v24, %v572_v25 }
 0x994   :  { %576 = vrot.lane.b32.xlu1 %v574_v26, %s2633_s2 }
 0xa06   :  { %v577_v29 = vpop.permute.xlu1 %576 }
 0xa07   :  { %v579_v30 = vadd.f32 %v577_v29, %v569_v28 }
 0xa09   :  { %2441 = vtanh.f32 %v579_v30  ;;  %v671_v46 = vrot.slane %v579_v30, 6 }
 0xa16   :  { %v2442_v13 = vpop.eup %2441 }
 0xa17   :  { %582 = vrot.lane.b32.xlu0 %v2442_v13, %s2632_s0 }
 0xa89   :  { %v583_v31 = vpop.permute.xlu0 %582 }
 0xa8a   :  { %v585_v32 = vmul.f32 %v2440_v24, %v583_v31 }
 0xa8c   :  { %v587_v33 = vrot.slane %v585_v32, 6  ;;  %v2822_v34 = vsel %vm1014_vm5, %v1013_v14, %v585_v32 }
 0xa8e   :  { %588 = vrot.lane.b32.xlu1 %v587_v33, %s2633_s2 }
 0xb00   :  { %v589_v35 = vpop.permute.xlu1 %588 }
 0xb01   :  { %2256 = vmatmul.mubr.msk.f32.vlgmr.msra.gmra.mxu1 %vm167_vm2, %v589_v35 }
 0xb02   :  { %2270 = vmatpush3.msra.mxu1 %v2703_v2  ;;  %2277 = vmatprep.mubr.msk.f32.mxu1 %vm2631_vm0, %v2630_v0 }
 0xb03   :  { %2271 = vmatprep.subr.mxu1 %v2630_v0 }
 0xb04   :  { %2272 = vmatpush3.msra.mxu1 %v2712_v4 }
 0xb05   :  { %2273 = vmatprep.subr.mxu1 %v2630_v0 }
 0xb06   :  { %2274 = vmatpush3.msra.mxu1 %v2725_v7 }
 0xb07   :  { %2275 = vmatprep.subr.mxu1 %v2630_v0 }
 0xb08   :  { %2276 = vmatpush3.msra.mxu1 %v2731_v8 }
 0xbc1   :  { %v658_v36 = vpop.f32.mrf.mxu1 }
 0xbc2   :  { %v662_v37 = vadd.f32 %v658_v36, %v2759_v11 }
 0xbc3   :  { %v2257_v38 = vpop.f32.mrf.mxu1 }
 0xbc4   :  { %2443 = vtanh.f32 %v662_v37  ;;  %v2074_v40 = vmul.f32 -1.442695, %v662_v37 }
 0xbc6   :  { %2445 = vpow2.f32 %v2074_v40 }
 0xbd1   :  { %v2444_v39 = vpop.eup %2443 }
 0xbd2   :  { %675 = vrot.lane.b32.xlu0 %v2444_v39, %s2632_s0 }
 0xbd3   :  { %v2446_v41 = vpop.eup %2445 }
 0xbd4   :  { %v666_v42 = vadd.f32 1.0, %v2446_v41 }
 0xbd6   :  { %2447 = vrcp.f32 %v666_v42 }
 0xbe3   :  { %v2448_v43 = vpop.eup %2447 }
 0xbe4   :  { %v673_v47 = vmul.f32 %v2448_v43, %v671_v46 }
 0xc44   :  { %v676_v44 = vpop.permute.xlu0 %675 }
 0xc45   :  { %v678_v45 = vmul.f32 %v2448_v43, %v676_v44 }
 0xc47   :  { %680 = vrot.lane.b32.xlu1 %v678_v45, %s2633_s2 }
 0xcb9   :  { %v681_v48 = vpop.permute.xlu1 %680 }
 0xcba   :  { %v683_v49 = vadd.f32 %v681_v48, %v673_v47 }
 0xcbc   :  { %2449 = vtanh.f32 %v683_v49 }
 0xcc9   :  { %v2450_v50 = vpop.eup %2449 }
 0xcca   :  { %686 = vrot.lane.b32.xlu0 %v2450_v50, %s2632_s0  ;;  %v1022_v50 = vld [vmem:[%s3062_s4 + $0x18] sm:$0xff] }
 0xccb   :  { %2291 = vmatprep.subr.mxu1 %v1022_v50 }
 0xd3c   :  { %v687_v51 = vpop.permute.xlu0 %686 }
 0xd3d   :  { %v2839_v52 = vmul.f32 %v2448_v43, %v687_v51  ;;  %v1021_v51 = vld [vmem:[%s3062_s4 + $0x10] sm:$0xff] }
 0xd3f   :  { %691 = vrot.lane.b32.xlu1 %v2839_v52, %s2633_s2 }
 0xdb1   :  { %v692_v53 = vpop.permute.xlu1 %691 }
 0xdb2   :  { %2267 = vmatmul.mubr.msk.f32.vlgmr.msra.gmra.mxu0 %vm167_vm2, %v692_v53  ;;  %v1020_v53 = vld [vmem:[%s3062_s4 + $0x8] sm:$0xff] }
 0xdb3   :  { %2281 = vmatpush3.msra.mxu0 %v2703_v2  ;;  %2288 = vmatprep.mubr.msk.f32.mxu0 %vm2631_vm0, %v2630_v0 }
 0xdb4   :  { %2282 = vmatprep.subr.mxu0 %v2630_v0 }
 0xdb5   :  { %2283 = vmatpush3.msra.mxu0 %v2712_v4 }
 0xdb6   :  { %2284 = vmatprep.subr.mxu0 %v2630_v0 }
 0xdb7   :  { %2285 = vmatpush3.msra.mxu0 %v2725_v7 }
 0xdb8   :  { %2286 = vmatprep.subr.mxu0 %v2630_v0 }
 0xdb9   :  { %2287 = vmatpush3.msra.mxu0 %v2731_v8  ;;  %v777_v8 = vrot.slane %v683_v49, 6 }
 0xdba   :  { %2302 = vmatprep.subr.mxu0 %v2630_v0 }
 0xe72   :  { %v761_v54 = vpop.f32.mrf.mxu0 }
 0xe73   :  { %v766_v55 = vrot.slane %v761_v54, 6  ;;  %v2894_v54 = vld [vmem:[#allocation5 + $0x8] sm:$0xff] }
 0xe74   :  { %v2268_v2 = vpop.f32.mrf.mxu0 }
 0xe75   :  { %v768_v56 = vadd.f32 %v766_v55, %v2759_v11  ;;  %v1019_v55 = vld [vmem:[%s3062_s4] sm:$0xff] }
 0xe77   :  { %2451 = vtanh.f32 %v768_v56  ;;  %v2076_v4 = vmul.f32 -1.442695, %v768_v56  ;;  %v2905_v56 = vld [vmem:[#allocation5] sm:$0xff] }
 0xe79   :  { %2453 = vpow2.f32 %v2076_v4 }
 0xe84   :  { %v2452_v57 = vpop.eup %2451 }
 0xe85   :  { %781 = vrot.lane.b32.xlu0 %v2452_v57, %s2632_s0 }
 0xe86   :  { %v2454_v58 = vpop.eup %2453 }
 0xe87   :  { %v772_v59 = vadd.f32 1.0, %v2454_v58 }
 0xe89   :  { %2455 = vrcp.f32 %v772_v59 }
 0xe96   :  { %v2456_v7 = vpop.eup %2455 }
 0xe97   :  { %v779_v62 = vmul.f32 %v2456_v7, %v777_v8 }
 0xef7   :  { %v782_v60 = vpop.permute.xlu0 %781 }
 0xef8   :  { %v784_v61 = vmul.f32 %v2456_v7, %v782_v60 }
 0xefa   :  { %786 = vrot.lane.b32.xlu1 %v784_v61, %s2633_s2  ;;  %v2081_v61 = vld [vmem:[%s3064_s6] ss:$0 sm:$0xff] }
 0xf6c   :  { %v787_v63 = vpop.permute.xlu1 %786 }
 0xf6d   :  { %v789_v1 = vadd.f32 %v787_v63, %v779_v62 }
 0xf6f   :  { %2457 = vtanh.f32 %v789_v1  ;;  %v884_v24 = vrot.slane %v789_v1, 6 }
 0xf7c   :  { %v2458_v3 = vpop.eup %2457 }
 0xf7d   :  { %792 = vrot.lane.b32.xlu0 %v2458_v3, %s2632_s0 }
 0xfef   :  { %v793_v5 = vpop.permute.xlu0 %792 }
 0xff0   :  { %v795_v6 = vmul.f32 %v2456_v7, %v793_v5 }
 0xff2   :  { %v797_v9 = vrot.slane %v795_v6, 2  ;;  %v1016_v13 = vsel %vm1010_vm3, %v2839_v52, %v795_v6  ;;  %v2885_v52 = vld [vmem:[#allocation5 + $0x18] sm:$0xff] }
 0xff4   :  { %798 = vrot.lane.b32.xlu1 %v797_v9, %s2633_s2 }
0x1066   :  { %v799_v10 = vpop.permute.xlu1 %798 }
0x1067   :  { %2278 = vmatmul.mubr.msk.f32.vlgmr.msra.gmra.mxu1 %vm167_vm2, %v799_v10 }
0x1068   :  { %2292 = vmatpush3.msra.mxu1 %v1022_v50 }
0x1069   :  { %2293 = vmatprep.subr.mxu1 %v1021_v51 }
0x106a   :  { %2294 = vmatpush3.msra.mxu1 %v1021_v51 }
0x106b   :  { %2295 = vmatprep.subr.mxu1 %v1020_v53 }
0x106c   :  { %2296 = vmatpush3.msra.mxu1 %v1020_v53 }
0x106d   :  { %2297 = vmatprep.subr.mxu1 %v1019_v55 }
0x106e   :  { %2298 = vmatpush3.msra.mxu1 %v1019_v55 }
0x106f   :  { %2313 = vmatprep.subr.mxu1 %v2630_v0 }
0x1127   :  { %v868_v12 = vpop.f32.mrf.mxu1 }
0x1128   :  { %v873_v14 = vrot.slane %v868_v12, 4 }
0x1129   :  { %v2279_v15 = vpop.f32.mrf.mxu1 }
0x112a   :  { %v875_v16 = vadd.f32 %v873_v14, %v2759_v11 }
0x112c   :  { %2459 = vtanh.f32 %v875_v16  ;;  %v2078_v18 = vmul.f32 -1.442695, %v875_v16 }
0x112e   :  { %2461 = vpow2.f32 %v2078_v18 }
0x1139   :  { %v2460_v17 = vpop.eup %2459 }
0x113a   :  { %888 = vrot.lane.b32.xlu0 %v2460_v17, %s2632_s0 }
0x113b   :  { %v2462_v19 = vpop.eup %2461 }
0x113c   :  { %v879_v20 = vadd.f32 1.0, %v2462_v19 }
0x113e   :  { %2463 = vrcp.f32 %v879_v20 }
0x114b   :  { %v2464_v21 = vpop.eup %2463 }
0x114c   :  { %v886_v25 = vmul.f32 %v2464_v21, %v884_v24 }
0x11ac   :  { %v889_v22 = vpop.permute.xlu0 %888 }
0x11ad   :  { %v891_v23 = vmul.f32 %v2464_v21, %v889_v22 }
0x11af   :  { %893 = vrot.lane.b32.xlu1 %v891_v23, %s2633_s2 }
0x1221   :  { %v894_v26 = vpop.permute.xlu1 %893 }
0x1222   :  { %v896_v27 = vadd.f32 %v894_v26, %v886_v25 }
0x1224   :  { %2465 = vtanh.f32 %v896_v27  ;;  %v991_v46 = vrot.slane %v896_v27, 6 }
0x1231   :  { %v2466_v28 = vpop.eup %2465 }
0x1232   :  { %899 = vrot.lane.b32.xlu0 %v2466_v28, %s2632_s0 }
0x12a4   :  { %v900_v29 = vpop.permute.xlu0 %899 }
0x12a5   :  { %v902_v30 = vmul.f32 %v2464_v21, %v900_v29 }
0x12a7   :  { %v904_v31 = vrot.slane %v902_v30, 4  ;;  %v2867_v32 = vsel %vm1012_vm4, %v1016_v13, %v902_v30 }
0x12a9   :  { %905 = vrot.lane.b32.xlu1 %v904_v31, %s2633_s2 }
0x131b   :  { %v906_v33 = vpop.permute.xlu1 %905 }
0x131c   :  { %2289 = vmatmul.mubr.msk.f32.vlgmr.msra.gmra.mxu0 %vm167_vm2, %v906_v33 }
0x131d   :  { %2310 = vmatprep.mubr.msk.f32.mxu0 %vm2631_vm0, %v2630_v0  ;;  %2303 = vmatpush3.msra.mxu0 %v2885_v52 }
0x131e   :  { %2304 = vmatprep.subr.mxu0 %v2630_v0 }
0x13dc   :  { %v975_v35 = vpop.f32.mrf.mxu0 }
0x13dd   :  { %v980_v36 = vrot.slane %v975_v35, 2 }
0x13de   :  { %v2290_v37 = vpop.f32.mrf.mxu0 }
0x13df   :  { %v982_v38 = vadd.f32 %v980_v36, %v2759_v11 }
0x13e1   :  { %2467 = vtanh.f32 %v982_v38  ;;  %v2080_v40 = vmul.f32 -1.442695, %v982_v38 }
0x13e3   :  { %2469 = vpow2.f32 %v2080_v40 }
0x13ee   :  { %v2468_v39 = vpop.eup %2467 }
0x13ef   :  { %995 = vrot.lane.b32.xlu0 %v2468_v39, %s2632_s0 }
0x13f0   :  { %v2470_v41 = vpop.eup %2469 }
0x13f1   :  { %v986_v42 = vadd.f32 1.0, %v2470_v41 }
0x13f3   :  { %2471 = vrcp.f32 %v986_v42 }
0x1400   :  { %v2472_v43 = vpop.eup %2471 }
0x1401   :  { %v993_v47 = vmul.f32 %v2472_v43, %v991_v46 }
0x1461   :  { %v996_v44 = vpop.permute.xlu0 %995 }
0x1462   :  { %v998_v45 = vmul.f32 %v2472_v43, %v996_v44 }
0x1464   :  { %1000 = vrot.lane.b32.xlu1 %v998_v45, %s2633_s2 }
0x1468   :  { %1036 = vrot.lane.b32.xlu1 %v2822_v34, %s2633_s2  ;;  %v2888_v34 = vld [vmem:[#allocation5 + $0x10] sm:$0xff] }
0x1469   :  { %2305 = vmatpush3.msra.mxu0 %v2888_v34 }
0x146a   :  { %2306 = vmatprep.subr.mxu0 %v2630_v0 }
0x146b   :  { %2307 = vmatpush3.msra.mxu0 %v2894_v54 }
0x146c   :  { %2308 = vmatprep.subr.mxu0 %v2630_v0 }
0x146d   :  { %2309 = vmatpush3.msra.mxu0 %v2905_v56 }
0x146e   :  { %2311 = vmatmul.mubr.f32.vlgmr.msra.gmra.mxu0 %v2630_v0  ;;  %2324 = vmatprep.subr.mxu0 %v2630_v0 }
0x146f   :  { %2325 = vmatpush3.msra.mxu0 %v2885_v52  ;;  %2332 = vmatprep.mubr.msk.f32.mxu0 %vm2631_vm0, %v2630_v0 }
0x1470   :  { %2326 = vmatprep.subr.mxu0 %v2630_v0 }
0x1471   :  { %2327 = vmatpush3.msra.mxu0 %v2888_v34 }
0x1472   :  { %2328 = vmatprep.subr.mxu0 %v2630_v0 }
0x1473   :  { %2329 = vmatpush3.msra.mxu0 %v2894_v54 }
0x1474   :  { %2330 = vmatprep.subr.mxu0 %v2630_v0 }
0x1475   :  { %2331 = vmatpush3.msra.mxu0 %v2905_v56 }
0x1476   :  { %2346 = vmatprep.subr.mxu0 %v2630_v0 }
0x14d6   :  { %v1001_v11 = vpop.permute.xlu1 %1000 }
0x14d7   :  { %v1003_v48 = vadd.f32 %v1001_v11, %v993_v47 }
0x14d9   :  { %2473 = vtanh.f32 %v1003_v48 }
0x14da   :  { %v1037_v49 = vpop.permute.xlu1 %1036 }
0x14db   :  { %2299 = vmatprep.mubr.msk.f32.mxu1 %vm167_vm2, %v1037_v49 }
0x14e6   :  { %v2474_v2 = vpop.eup %2473 }
0x14e7   :  { %1006 = vrot.lane.b32.xlu0 %v2474_v2, %s2632_s0 }
0x152e   :  { %v1185_v7 = vpop.f32.mrf.mxu0 }
0x1530   :  { %v2312_v60 = vpop.f32.mrf.mxu0 }
0x1559   :  { %v1007_v57 = vpop.permute.xlu0 %1006 }
0x155a   :  { %v1009_v4 = vmul.f32 %v2472_v43, %v1007_v57 }
0x155c   :  { %v1018_v58 = vsel %vm1014_vm5, %v2867_v32, %v1009_v4 }
0x155d   :  { %1038 = vrot.lane.b32.xlu0 %v1018_v58, %s2633_s2 }
0x15cf   :  { %v1039_v59 = vpop.permute.xlu0 %1038 }
0x15d0   :  { %2300 = vmatmul.mubr.msk.f32.vlgmr.msra.gmra.mxu1 %vm167_vm2, %v1039_v59 }
0x15d1   :  { %2314 = vmatpush3.msra.mxu1 %v2885_v52  ;;  %2321 = vmatprep.mubr.msk.f32.mxu1 %vm2631_vm0, %v2630_v0 }
0x15d2   :  { %2315 = vmatprep.subr.mxu1 %v2630_v0 }
0x15d3   :  { %2316 = vmatpush3.msra.mxu1 %v2888_v34 }
0x15d4   :  { %2317 = vmatprep.subr.mxu1 %v2630_v0 }
0x15d5   :  { %2318 = vmatpush3.msra.mxu1 %v2894_v54 }
0x15d6   :  { %2319 = vmatprep.subr.mxu1 %v2630_v0 }
0x15d7   :  { %2320 = vmatpush3.msra.mxu1 %v2905_v56 }
0x15d8   :  { %2335 = vmatprep.subr.mxu1 %v2630_v0 }
0x1690   :  { %v2301_v8 = vpop.f32.mrf.mxu1 }
0x1691   :  { %v2937_v62 = vadd.f32 %v2301_v8, %v2081_v61 }
0x1692   :  { %v1110_v63 = vpop.f32.mrf.mxu1 }
0x1693   :  { %v2939_v1 = vadd.f32 %v2081_v61, %v1110_v63 }
0x1695   :  { %v1189_v3 = vadd.f32 %v1185_v7, %v2939_v1 }
0x1697   :  { %2475 = vtanh.f32 %v1189_v3  ;;  %v2084_v6 = vmul.f32 -1.442695, %v1189_v3 }
0x1699   :  { %2477 = vpow2.f32 %v2084_v6 }
0x16a4   :  { %v2476_v5 = vpop.eup %2475 }
0x16a5   :  { %1199 = vrot.lane.b32.xlu1 %v2476_v5, %s2632_s0 }
0x16a6   :  { %v2478_v9 = vpop.eup %2477 }
0x16a7   :  { %v1193_v10 = vadd.f32 1.0, %v2478_v9 }
0x16a9   :  { %2479 = vrcp.f32 %v1193_v10 }
0x16b6   :  { %v2480_v12 = vpop.eup %2479 }
0x16b7   :  { %v1197_v16 = vmul.f32 0.0, %v2480_v12 }
0x1717   :  { %v1200_v14 = vpop.permute.xlu1 %1199 }
0x1718   :  { %v1202_v15 = vmul.f32 %v2480_v12, %v1200_v14 }
0x171a   :  { %1204 = vrot.lane.b32.xlu0 %v1202_v15, %s2633_s2 }
0x178c   :  { %v1205_v17 = vpop.permute.xlu0 %1204 }
0x178d   :  { %v1207_v18 = vadd.f32 %v1205_v17, %v1197_v16 }
0x178f   :  { %2481 = vtanh.f32 %v1207_v18  ;;  %v1301_v33 = vrot.slane %v1207_v18, 6 }
0x179c   :  { %v2482_v19 = vpop.eup %2481 }
0x179d   :  { %1210 = vrot.lane.b32.xlu1 %v2482_v19, %s2632_s0 }
0x180f   :  { %v1211_v20 = vpop.permute.xlu1 %1210 }
0x1810   :  { %v1213_v21 = vmul.f32 %v2480_v12, %v1211_v20 }
0x1812   :  { %1215 = vrot.lane.b32.xlu0 %v1213_v21, %s2633_s2 }
0x1884   :  { %v1216_v22 = vpop.permute.xlu0 %1215 }
0x1885   :  { %2322 = vmatmul.mubr.msk.f32.vlgmr.msra.gmra.mxu1 %vm167_vm2, %v1216_v22 }
0x1886   :  { %2336 = vmatpush3.msra.mxu1 %v2885_v52  ;;  %2343 = vmatprep.mubr.msk.f32.mxu1 %vm2631_vm0, %v2630_v0 }
0x1887   :  { %2337 = vmatprep.subr.mxu1 %v2630_v0 }
0x1888   :  { %2338 = vmatpush3.msra.mxu1 %v2888_v34 }
0x1889   :  { %2339 = vmatprep.subr.mxu1 %v2630_v0 }
0x188a   :  { %2340 = vmatpush3.msra.mxu1 %v2894_v54 }
0x188b   :  { %2341 = vmatprep.subr.mxu1 %v2630_v0 }
0x188c   :  { %2342 = vmatpush3.msra.mxu1 %v2905_v56 }
0x188d   :  { %2357 = vmatprep.subr.mxu1 %v2630_v0 }
0x1945   :  { %v1285_v23 = vpop.f32.mrf.mxu1 }
0x1946   :  { %v1290_v24 = vrot.slane %v1285_v23, 6 }
0x1947   :  { %v2323_v25 = vpop.f32.mrf.mxu1 }
0x1948   :  { %v1292_v26 = vadd.f32 %v1290_v24, %v2939_v1 }
0x194a   :  { %2483 = vtanh.f32 %v1292_v26  ;;  %v2086_v28 = vmul.f32 -1.442695, %v1292_v26 }
0x194c   :  { %2485 = vpow2.f32 %v2086_v28 }
0x1957   :  { %v2484_v27 = vpop.eup %2483 }
0x1958   :  { %1305 = vrot.lane.b32.xlu1 %v2484_v27, %s2632_s0 }
0x1959   :  { %v2486_v29 = vpop.eup %2485 }
0x195a   :  { %v1296_v30 = vadd.f32 1.0, %v2486_v29 }
0x195c   :  { %2487 = vrcp.f32 %v1296_v30 }
0x1969   :  { %v2488_v13 = vpop.eup %2487 }
0x196a   :  { %v1303_v35 = vmul.f32 %v2488_v13, %v1301_v33 }
0x19ca   :  { %v1306_v31 = vpop.permute.xlu1 %1305 }
0x19cb   :  { %v1308_v32 = vmul.f32 %v2488_v13, %v1306_v31 }
0x19cd   :  { %1310 = vrot.lane.b32.xlu0 %v1308_v32, %s2633_s2 }
0x1a3f   :  { %v1311_v36 = vpop.permute.xlu0 %1310 }
0x1a40   :  { %v1313_v37 = vadd.f32 %v1311_v36, %v1303_v35 }
0x1a42   :  { %2489 = vtanh.f32 %v1313_v37  ;;  %v1408_v55 = vrot.slane %v1313_v37, 6 }
0x1a4f   :  { %v2490_v38 = vpop.eup %2489 }
0x1a50   :  { %1316 = vrot.lane.b32.xlu1 %v2490_v38, %s2632_s0 }
0x1ac2   :  { %v1317_v39 = vpop.permute.xlu1 %1316 }
0x1ac3   :  { %v1319_v40 = vmul.f32 %v2488_v13, %v1317_v39 }
0x1ac5   :  { %v1321_v41 = vrot.slane %v1319_v40, 2 }
0x1ac7   :  { %1322 = vrot.lane.b32.xlu0 %v1321_v41, %s2633_s2 }
0x1b39   :  { %v1323_v42 = vpop.permute.xlu0 %1322 }
0x1b3a   :  { %2333 = vmatmul.mubr.msk.f32.vlgmr.msra.gmra.mxu0 %vm167_vm2, %v1323_v42 }
0x1b3b   :  { %2347 = vmatpush3.msra.mxu0 %v2885_v52  ;;  %2354 = vmatprep.mubr.msk.f32.mxu0 %vm2631_vm0, %v2630_v0 }
0x1b3c   :  { %2348 = vmatprep.subr.mxu0 %v2630_v0 }
0x1b3d   :  { %2349 = vmatpush3.msra.mxu0 %v2888_v34 }
0x1b3e   :  { %2350 = vmatprep.subr.mxu0 %v2630_v0 }
0x1b3f   :  { %2351 = vmatpush3.msra.mxu0 %v2894_v54 }
0x1b40   :  { %2352 = vmatprep.subr.mxu0 %v2630_v0 }
0x1b41   :  { %2353 = vmatpush3.msra.mxu0 %v2905_v56 }
0x1b42   :  { %2368 = vmatprep.subr.mxu0 %v2630_v0 }
0x1bfa   :  { %v1392_v43 = vpop.f32.mrf.mxu0 }
0x1bfb   :  { %v1397_v44 = vrot.slane %v1392_v43, 4 }
0x1bfc   :  { %v2334_v45 = vpop.f32.mrf.mxu0 }
0x1bfd   :  { %v1399_v46 = vadd.f32 %v1397_v44, %v2939_v1 }
0x1bff   :  { %2491 = vtanh.f32 %v1399_v46  ;;  %v2088_v11 = vmul.f32 -1.442695, %v1399_v46 }
0x1c01   :  { %2493 = vpow2.f32 %v2088_v11 }
0x1c0c   :  { %v2492_v47 = vpop.eup %2491 }
0x1c0d   :  { %1412 = vrot.lane.b32.xlu1 %v2492_v47, %s2632_s0 }
0x1c0e   :  { %v2494_v48 = vpop.eup %2493 }
0x1c0f   :  { %v1403_v49 = vadd.f32 1.0, %v2494_v48 }
0x1c11   :  { %2495 = vrcp.f32 %v1403_v49 }
0x1c1e   :  { %v2496_v50 = vpop.eup %2495 }
0x1c1f   :  { %v1410_v2 = vmul.f32 %v2496_v50, %v1408_v55 }
0x1c7f   :  { %v1413_v51 = vpop.permute.xlu1 %1412 }
0x1c80   :  { %v1415_v53 = vmul.f32 %v2496_v50, %v1413_v51 }
0x1c82   :  { %1417 = vrot.lane.b32.xlu0 %v1415_v53, %s2633_s2 }
0x1cf4   :  { %v1418_v57 = vpop.permute.xlu0 %1417 }
0x1cf5   :  { %v1420_v4 = vadd.f32 %v1418_v57, %v1410_v2 }
0x1cf7   :  { %2497 = vtanh.f32 %v1420_v4  ;;  %v1515_v17 = vrot.slane %v1420_v4, 6 }
0x1d04   :  { %v2498_v58 = vpop.eup %2497 }
0x1d05   :  { %1423 = vrot.lane.b32.xlu1 %v2498_v58, %s2632_s0 }
0x1d77   :  { %v1424_v59 = vpop.permute.xlu1 %1423 }
0x1d78   :  { %v1426_v7 = vmul.f32 %v2496_v50, %v1424_v59 }
0x1d7a   :  { %v1428_v60 = vrot.slane %v1426_v7, 4 }
0x1d7c   :  { %1429 = vrot.lane.b32.xlu0 %v1428_v60, %s2633_s2 }
0x1dee   :  { %v1430_v61 = vpop.permute.xlu0 %1429 }
0x1def   :  { %2344 = vmatmul.mubr.msk.f32.vlgmr.msra.gmra.mxu1 %vm167_vm2, %v1430_v61 }
0x1df0   :  { %2358 = vmatpush3.msra.mxu1 %v2885_v52  ;;  %2365 = vmatprep.mubr.msk.f32.mxu1 %vm2631_vm0, %v2630_v0 }
0x1df1   :  { %2359 = vmatprep.subr.mxu1 %v2630_v0 }
0x1df2   :  { %2360 = vmatpush3.msra.mxu1 %v2888_v34 }
0x1df3   :  { %2361 = vmatprep.subr.mxu1 %v2630_v0 }
0x1df4   :  { %2362 = vmatpush3.msra.mxu1 %v2894_v54 }
0x1df5   :  { %2363 = vmatprep.subr.mxu1 %v2630_v0 }
0x1df6   :  { %2364 = vmatpush3.msra.mxu1 %v2905_v56 }
0x1df7   :  { %2379 = vmatprep.subr.mxu1 %v2630_v0 }
0x1eaf   :  { %v1499_v8 = vpop.f32.mrf.mxu1 }
0x1eb0   :  { %v1504_v63 = vrot.slane %v1499_v8, 2 }
0x1eb1   :  { %v2345_v3 = vpop.f32.mrf.mxu1 }
0x1eb2   :  { %v1506_v5 = vadd.f32 %v1504_v63, %v2939_v1 }
0x1eb4   :  { %2499 = vtanh.f32 %v1506_v5  ;;  %v2090_v9 = vmul.f32 -1.442695, %v1506_v5 }
0x1eb6   :  { %2501 = vpow2.f32 %v2090_v9 }
0x1ec1   :  { %v2500_v6 = vpop.eup %2499 }
0x1ec2   :  { %1519 = vrot.lane.b32.xlu1 %v2500_v6, %s2632_s0 }
0x1ec3   :  { %v2502_v10 = vpop.eup %2501 }
0x1ec4   :  { %v1510_v12 = vadd.f32 1.0, %v2502_v10 }
0x1ec6   :  { %2503 = vrcp.f32 %v1510_v12 }
0x1ed3   :  { %v2504_v14 = vpop.eup %2503 }
0x1ed4   :  { %v1517_v18 = vmul.f32 %v2504_v14, %v1515_v17 }
0x1f34   :  { %v1520_v15 = vpop.permute.xlu1 %1519 }
0x1f35   :  { %v1522_v16 = vmul.f32 %v2504_v14, %v1520_v15 }
0x1f37   :  { %1524 = vrot.lane.b32.xlu0 %v1522_v16, %s2633_s2 }
0x1fa9   :  { %v1525_v19 = vpop.permute.xlu0 %1524 }
0x1faa   :  { %v1527_v20 = vadd.f32 %v1525_v19, %v1517_v18 }
0x1fac   :  { %2505 = vtanh.f32 %v1527_v20  ;;  %v1619_v35 = vrot.slane %v1527_v20, 6 }
0x1fb9   :  { %v2506_v1 = vpop.eup %2505 }
0x1fba   :  { %1530 = vrot.lane.b32.xlu1 %v2506_v1, %s2632_s0 }
0x202c   :  { %v1531_v21 = vpop.permute.xlu1 %1530 }
0x202d   :  { %v1533_v22 = vmul.f32 %v2504_v14, %v1531_v21 }
0x202f   :  { %v1535_v23 = vrot.slane %v1533_v22, 6 }
0x2031   :  { %1536 = vrot.lane.b32.xlu0 %v1535_v23, %s2633_s2 }
0x20a3   :  { %v1537_v24 = vpop.permute.xlu0 %1536 }
0x20a4   :  { %2355 = vmatmul.mubr.msk.f32.vlgmr.msra.gmra.mxu0 %vm167_vm2, %v1537_v24 }
0x20a5   :  { %2369 = vmatpush3.msra.mxu0 %v2885_v52  ;;  %2376 = vmatprep.mubr.msk.f32.mxu0 %vm2631_vm0, %v2630_v0 }
0x20a6   :  { %2370 = vmatprep.subr.mxu0 %v2630_v0 }
0x20a7   :  { %2371 = vmatpush3.msra.mxu0 %v2888_v34 }
0x20a8   :  { %2372 = vmatprep.subr.mxu0 %v2630_v0 }
0x20a9   :  { %2373 = vmatpush3.msra.mxu0 %v2894_v54 }
0x20aa   :  { %2374 = vmatprep.subr.mxu0 %v2630_v0 }
0x20ab   :  { %2375 = vmatpush3.msra.mxu0 %v2905_v56 }
0x20ac   :  { %2390 = vmatprep.subr.mxu0 %v2630_v0 }
0x2164   :  { %v1606_v25 = vpop.f32.mrf.mxu0 }
0x2165   :  { %v1610_v26 = vadd.f32 %v1606_v25, %v2937_v62 }
0x2166   :  { %v2356_v27 = vpop.f32.mrf.mxu0 }
0x2167   :  { %2507 = vtanh.f32 %v1610_v26  ;;  %v2092_v29 = vmul.f32 -1.442695, %v1610_v26 }
0x2169   :  { %2509 = vpow2.f32 %v2092_v29 }
0x2174   :  { %v2508_v28 = vpop.eup %2507 }
0x2175   :  { %1623 = vrot.lane.b32.xlu1 %v2508_v28, %s2632_s0 }
0x2176   :  { %v2510_v30 = vpop.eup %2509 }
0x2177   :  { %v1614_v13 = vadd.f32 1.0, %v2510_v30 }
0x2179   :  { %2511 = vrcp.f32 %v1614_v13 }
0x2186   :  { %v2512_v31 = vpop.eup %2511 }
0x2187   :  { %v1621_v36 = vmul.f32 %v2512_v31, %v1619_v35 }
0x21e7   :  { %v1624_v32 = vpop.permute.xlu1 %1623 }
0x21e8   :  { %v1626_v33 = vmul.f32 %v2512_v31, %v1624_v32 }
0x21ea   :  { %1628 = vrot.lane.b32.xlu0 %v1626_v33, %s2633_s2 }
0x225c   :  { %v1629_v37 = vpop.permute.xlu0 %1628 }
0x225d   :  { %v1631_v38 = vadd.f32 %v1629_v37, %v1621_v36  ;;  %v1960_v36 = vld [vmem:[%s3065_s7 + $0x10] sm:$0xff]  ;;  %v1959_v37 = vld [vmem:[%s3065_s7 + $0x8] sm:$0xff] }
0x225f   :  { %2513 = vtanh.f32 %v1631_v38 }
0x226c   :  { %v2514_v39 = vpop.eup %2513 }
0x226d   :  { %1634 = vrot.lane.b32.xlu1 %v2514_v39, %s2632_s0 }
0x22df   :  { %v1635_v40 = vpop.permute.xlu1 %1634 }
0x22e0   :  { %v1637_v41 = vmul.f32 %v2512_v31, %v1635_v40 }
0x22e2   :  { %1639 = vrot.lane.b32.xlu0 %v1637_v41, %s2633_s2 }
0x2354   :  { %v1640_v42 = vpop.permute.xlu0 %1639 }
0x2355   :  { %2366 = vmatmul.mubr.msk.f32.vlgmr.msra.gmra.mxu1 %vm167_vm2, %v1640_v42 }
0x2356   :  { %2380 = vmatpush3.msra.mxu1 %v2885_v52  ;;  %2387 = vmatprep.mubr.msk.f32.mxu1 %vm2631_vm0, %v2630_v0 }
0x2357   :  { %2381 = vmatprep.subr.mxu1 %v2630_v0 }
0x2358   :  { %2382 = vmatpush3.msra.mxu1 %v2888_v34 }
0x2359   :  { %2383 = vmatprep.subr.mxu1 %v2630_v0 }
0x235a   :  { %2384 = vmatpush3.msra.mxu1 %v2894_v54 }
0x235b   :  { %2385 = vmatprep.subr.mxu1 %v2630_v0 }
0x235c   :  { %2386 = vmatpush3.msra.mxu1 %v2905_v56  ;;  %v1725_v56 = vrot.slane %v1631_v38, 6  ;;  %v1958_v38 = vld [vmem:[%s3065_s7] sm:$0xff] }
0x2415   :  { %v1709_v43 = vpop.f32.mrf.mxu1 }
0x2416   :  { %v1714_v44 = vrot.slane %v1709_v43, 6 }
0x2417   :  { %v2367_v45 = vpop.f32.mrf.mxu1 }
0x2418   :  { %v1716_v52 = vadd.f32 %v1714_v44, %v2937_v62  ;;  %v2099_v44 = vld [vmem:[#allocation7] ss:$0 sm:$0xff] }
0x241a   :  { %2515 = vtanh.f32 %v1716_v52  ;;  %v2094_v47 = vmul.f32 -1.442695, %v1716_v52 }
0x241c   :  { %2517 = vpow2.f32 %v2094_v47 }
0x2427   :  { %v2516_v46 = vpop.eup %2515 }
0x2428   :  { %1729 = vrot.lane.b32.xlu1 %v2516_v46, %s2632_s0 }
0x2429   :  { %v2518_v34 = vpop.eup %2517 }
0x242a   :  { %v1720_v11 = vadd.f32 1.0, %v2518_v34 }
0x242c   :  { %2519 = vrcp.f32 %v1720_v11 }
0x2439   :  { %v2520_v48 = vpop.eup %2519 }
0x243a   :  { %v1727_v50 = vmul.f32 %v2520_v48, %v1725_v56 }
0x249a   :  { %v1730_v54 = vpop.permute.xlu1 %1729 }
0x249b   :  { %v1732_v49 = vmul.f32 %v2520_v48, %v1730_v54 }
0x249d   :  { %1734 = vrot.lane.b32.xlu0 %v1732_v49, %s2633_s2 }
0x250f   :  { %v1735_v51 = vpop.permute.xlu0 %1734 }
0x2510   :  { %v1737_v53 = vadd.f32 %v1735_v51, %v1727_v50 }
0x2512   :  { %2521 = vtanh.f32 %v1737_v53  ;;  %v1832_v12 = vrot.slane %v1737_v53, 6 }
0x251f   :  { %v2522_v55 = vpop.eup %2521 }
0x2520   :  { %1740 = vrot.lane.b32.xlu1 %v2522_v55, %s2632_s0 }
0x2592   :  { %v1741_v2 = vpop.permute.xlu1 %1740 }
0x2593   :  { %v1743_v57 = vmul.f32 %v2520_v48, %v1741_v2 }
0x2595   :  { %v1745_v4 = vrot.slane %v1743_v57, 2 }
0x2597   :  { %1746 = vrot.lane.b32.xlu0 %v1745_v4, %s2633_s2 }
0x2609   :  { %v1747_v58 = vpop.permute.xlu0 %1746 }
0x260a   :  { %2377 = vmatmul.mubr.msk.f32.vlgmr.msra.gmra.mxu0 %vm167_vm2, %v1747_v58 }
0x260b   :  { %2398 = vmatprep.mubr.msk.f32.mxu0 %vm2631_vm0, %v2630_v0 }
0x26ca   :  { %v1816_v59 = vpop.f32.mrf.mxu0 }
0x26cb   :  { %v1821_v7 = vrot.slane %v1816_v59, 4 }
0x26cc   :  { %v2378_v60 = vpop.f32.mrf.mxu0 }
0x26cd   :  { %v1823_v61 = vadd.f32 %v1821_v7, %v2937_v62 }
0x26cf   :  { %2523 = vtanh.f32 %v1823_v61  ;;  %v2096_v63 = vmul.f32 -1.442695, %v1823_v61 }
0x26d1   :  { %2525 = vpow2.f32 %v2096_v63 }
0x26dc   :  { %v2524_v8 = vpop.eup %2523 }
0x26dd   :  { %1836 = vrot.lane.b32.xlu1 %v2524_v8, %s2632_s0 }
0x26de   :  { %v2526_v3 = vpop.eup %2525 }
0x26df   :  { %v1827_v5 = vadd.f32 1.0, %v2526_v3 }
0x26e1   :  { %2527 = vrcp.f32 %v1827_v5 }
0x26ee   :  { %v2528_v6 = vpop.eup %2527 }
0x26ef   :  { %v1834_v14 = vmul.f32 %v2528_v6, %v1832_v12 }
0x274f   :  { %v1837_v9 = vpop.permute.xlu1 %1836 }
0x2750   :  { %v1839_v10 = vmul.f32 %v2528_v6, %v1837_v9 }
0x2752   :  { %1841 = vrot.lane.b32.xlu0 %v1839_v10, %s2633_s2 }
0x27c4   :  { %v1842_v15 = vpop.permute.xlu0 %1841 }
0x27c5   :  { %v1844_v16 = vadd.f32 %v1842_v15, %v1834_v14 }
0x27c7   :  { %2529 = vtanh.f32 %v1844_v16  ;;  %v1939_v31 = vrot.slane %v1844_v16, 6 }
0x27d4   :  { %v2530_v17 = vpop.eup %2529 }
0x27d5   :  { %1847 = vrot.lane.b32.xlu1 %v2530_v17, %s2632_s0 }
0x2847   :  { %v1848_v18 = vpop.permute.xlu1 %1847 }
0x2848   :  { %v1850_v19 = vmul.f32 %v2528_v6, %v1848_v18 }
0x284a   :  { %v1852_v20 = vrot.slane %v1850_v19, 4 }
0x284c   :  { %1853 = vrot.lane.b32.xlu0 %v1852_v20, %s2633_s2 }
0x28be   :  { %v1854_v1 = vpop.permute.xlu0 %1853 }
0x28bf   :  { %2388 = vmatmul.mubr.msk.f32.vlgmr.msra.gmra.mxu1 %vm167_vm2, %v1854_v1 }
0x297f   :  { %v1923_v21 = vpop.f32.mrf.mxu1 }
0x2980   :  { %v1928_v22 = vrot.slane %v1923_v21, 2 }
0x2981   :  { %v2389_v23 = vpop.f32.mrf.mxu1 }
0x2982   :  { %v1930_v24 = vadd.f32 %v1928_v22, %v2937_v62  ;;  %v1961_v62 = vld [vmem:[%s3065_s7 + $0x18] sm:$0xff]  ;;  %s2599_s7 = scalar_lea.vmem %s2054_s12, 32 }
0x2983   :  { %2391 = vmatpush3.msra.mxu0 %v1961_v62  ;;  %p2600_p1 = scmp.ne.s32.totalorder %s2054_s12, %s2599_s7  ;;  %p2605_p3 = scmp.lt.s32.totalorder %s2599_s7, %s2599_s7 }
0x2984   :  { %2531 = vtanh.f32 %v1930_v24  ;;  %v2098_v26 = vmul.f32 -1.442695, %v1930_v24  ;;  %2392 = vmatprep.subr.mxu0 %v2630_v0 }
0x2985   :  { %2393 = vmatpush3.msra.mxu0 %v1960_v36  ;;  %p2606_p4 = por %p2605_p3, %p2604_p2 }
0x2986   :  { %2533 = vpow2.f32 %v2098_v26  ;;  %2394 = vmatprep.subr.mxu0 %v2630_v0 }
0x2987   :  { %2395 = vmatpush3.msra.mxu0 %v1959_v37  ;;  %p2607_p5 = pnand %p2606_p4, %p2600_p1 }
0x2988   :  { %2396 = vmatprep.subr.mxu0 %v2630_v0 }
0x2989   :  { %2397 = vmatpush3.msra.mxu0 %v1958_v38 }
0x2991   :  { %v2532_v25 = vpop.eup %2531 }
0x2992   :  { %1943 = vrot.lane.b32.xlu1 %v2532_v25, %s2632_s0 }
0x2993   :  { %v2534_v27 = vpop.eup %2533 }
0x2994   :  { %v1934_v28 = vadd.f32 1.0, %v2534_v27 }
0x2996   :  { %2535 = vrcp.f32 %v1934_v28 }
0x29a3   :  { %v2536_v29 = vpop.eup %2535 }
0x29a4   :  { %v1941_v32 = vmul.f32 %v2536_v29, %v1939_v31 }
0x2a04   :  { %v1944_v30 = vpop.permute.xlu1 %1943 }
0x2a05   :  { %v1946_v13 = vmul.f32 %v2536_v29, %v1944_v30 }
0x2a07   :  { %1948 = vrot.lane.b32.xlu0 %v1946_v13, %s2633_s2 }
0x2a79   :  { %v1949_v33 = vpop.permute.xlu0 %1948 }
0x2a7a   :  { %v1951_v35 = vadd.f32 %v1949_v33, %v1941_v32 }
0x2a7c   :  { %2537 = vtanh.f32 %v1951_v35 }
0x2a89   :  { %v2538_v39 = vpop.eup %2537 }
0x2a8a   :  { %1954 = vrot.lane.b32.xlu1 %v2538_v39, %s2632_s0 }
0x2afc   :  { %v1955_v40 = vpop.permute.xlu1 %1954 }
0x2afd   :  { %v1957_v41 = vmul.f32 %v2536_v29, %v1955_v40 }
0x2aff   :  { %v1970_v42 = vrot.slane %v1957_v41, 6 }
0x2b01   :  { %1971 = vrot.lane.b32.xlu0 %v1970_v42, %s2633_s2 }
0x2b73   :  { %v1972_v43 = vpop.permute.xlu0 %1971 }
0x2b74   :  { %2399 = vmatmul.mubr.msk.f32.vlgmr.msra.gmra.mxu0 %vm167_vm2, %v1972_v43 }
0x2c34   :  { %v2041_v45 = vpop.f32.mrf.mxu0 }
0x2c35   :  { %v2042_v52 = vadd.f32 %v2099_v44, %v2041_v45 }
0x2c36   :  { %v2400_v0 = vpop.f32.mrf.mxu0 }
0x2c37   :  { %2046 = vst.msk [vmem:[#allocation8] sm:$0x3] %vm2045_vm6, %v2042_v52 }
0x2c38   :  { %2610 = shalt.err (!%p2607_p5)
}
0x2c39   :  { %2056 = dma.vmem_to_hbm [thread:$0]  %s2054_s12, 32, %s3067_s9, [#allocation4]  }
0x2c3a   :  { %2623 = dma.done.wait [#allocation4], 32  }
0x2c3b   :  { %2624 = vsyncadd [#allocation4], 4294967264 }
0x2c3c   :  { %2060 = vsyncpa [#allocation3], 1 }
0x2c3d   :  { %2061 = vsyncpa [#allocation6], 1 }
0x2c3e   :  { %2062 = vsyncpa [#allocation4], 1 }

</bundles_post_ra>
